<compile_context>
chip_gen: v7x
topology: tpu7x:2x2x1
jax: 0.10.0
libtpu: 0.0.40
codegen_flags: <defaults>
</compile_context>

<pallas_src>
import functools

import jax
import jax.numpy as jnp
from jax.experimental import pallas as pl
from jax.experimental.pallas import tpu as pltpu

C_OUT = 3      # conv out_channels
KSIZE = 3      # conv kernel_size


def _round_up(n, m):
    return ((n + m - 1) // m) * m


def fused_dqn_kernel(cw_ref, cb_ref, x_ref, mlo_ref, mhi_ref,
                     w1_ref, b1_ref, w2_ref, b2_ref,
                     o_ref, feat_ref, acc_ref, *, Bp, W, HW):
    """Grid axis k in [0, C_OUT): K-streamed reduction of the first matmul.

    cw_ref : SMEM (27,)  conv weights flattened [c, kh, kw]
    cb_ref : SMEM (3,)   conv bias
    x_ref  : VMEM [Bp, HW + 2W + 2]  flat image with a zero halo of W+1 each side
    mlo/mhi: VMEM [1, HW] 0/1 masks killing the w==0 / w==W-1 wrap reads
    w1_ref : VMEM [HW, Hpad]  K-tile k of layer2's Linear (streamed per step)
    b1_ref : VMEM [1, Hpad];  w2_ref: VMEM [Hpad, Opad];  b2_ref: VMEM [1, Opad]
    o_ref  : VMEM [Bp, Opad]
    feat_ref: VMEM scratch [C_OUT, Bp, HW]  conv+ReLU output, channel-major
              (== torch.nn.Flatten order)
    acc_ref : VMEM scratch [Bp, Hpad] f32 hidden accumulator
    """
    k = pl.program_id(0)
    nk = pl.num_programs(0)

    @pl.when(k == 0)
    def _conv_and_init():
        x = x_ref[...]                       # [Bp, HW + 2W + 2], f32
        mlo = mlo_ref[...]                   # [1, HW]
        mhi = mhi_ref[...]
        # 9 shifted (+ edge-masked) taps, computed once, reused by all channels.
        taps = []
        for dh in (-1, 0, 1):
            for dw in (-1, 0, 1):
                base = (W + 1) + dh * W + dw          # static offset into halo'd row
                v = x[:, base:base + HW]
                if dw == -1:
                    v = v * mlo
                elif dw == 1:
                    v = v * mhi
                taps.append(v)
        for c in range(C_OUT):
            acc = jnp.full((Bp, HW), cb_ref[c], dtype=jnp.float32)
            for t in range(KSIZE * KSIZE):
                acc = acc + cw_ref[c * (KSIZE * KSIZE) + t] * taps[t]
            feat_ref[c] = jnp.maximum(acc, 0.0).astype(feat_ref.dtype)
        # fold b1 into the accumulator init
        acc_ref[...] = jnp.zeros(acc_ref.shape, jnp.float32) + b1_ref[...]

    # K-streamed first matmul: conv channel k  x  w1 rows [k*HW, (k+1)*HW).
    acc_ref[...] += jnp.dot(feat_ref[k], w1_ref[...],
                            preferred_element_type=jnp.float32)

    @pl.when(k == nk - 1)
    def _finalize():
        h = jnp.maximum(acc_ref[...], 0.0)      # ReLU; Dropout in eval = identity
        q = jnp.dot(h.astype(w2_ref.dtype), w2_ref[...],
                    preferred_element_type=jnp.float32) + b2_ref[...]
        o_ref[...] = jnp.maximum(q, 0.0)


def dqn_forward(x, params, compute_dtype=jnp.float32):
    conv_w = params["conv_w"]   # [3, 3, 3]  (out_ch, kh, kw); in_ch == 1 squeezed
    conv_b = params["conv_b"]   # [3]
    w1, b1 = params["w1"], params["b1"]   # [F, hidden], [hidden]
    w2, b2 = params["w2"], params["b2"]   # [hidden, out], [out]

    B, c_in, H, W = x.shape
    assert c_in == 1
    HW = H * W
    F = C_OUT * HW
    assert w1.shape[0] == F
    hidden = w1.shape[1]
    out_dim = w2.shape[1]
    # Lane-dense layout: the flattened spatial extent sits on the lane axis.
    assert HW % 128 == 0, "H*W must be a multiple of 128 (e.g. 16x16 or 80x80)"

    Bp = _round_up(max(B, 8), 8)         # pad batch to full sublanes
    Hpad = _round_up(hidden, 128)        # pad hidden / output dims to full lanes
    Opad = _round_up(out_dim, 128)
    TK = HW                              # one conv channel per K step
    nk = C_OUT

    # ---- glue (cheap, O(B*H*W)) ------------------------------------------
    x_flat = x[:, 0].astype(jnp.float32).reshape(B, HW)
    x_flat = jnp.pad(x_flat, ((0, Bp - B), (W + 1, W + 1)))     # flat H-halo

    col = jnp.arange(HW, dtype=jnp.int32) % W
    mask_lo = (col != 0).astype(jnp.float32)[None, :]           # for dw = -1 taps
    mask_hi = (col != W - 1).astype(jnp.float32)[None, :]       # for dw = +1 taps

    cd = compute_dtype
    w1_p = jnp.zeros((F, Hpad), cd).at[:, :hidden].set(w1.astype(cd))
    b1_p = jnp.zeros((1, Hpad), jnp.float32).at[:, :hidden].set(b1.astype(jnp.float32))
    w2_p = jnp.zeros((Hpad, Opad), cd).at[:hidden, :out_dim].set(w2.astype(cd))
    b2_p = jnp.zeros((1, Opad), jnp.float32).at[:, :out_dim].set(b2.astype(jnp.float32))

    # ---- explicit VMEM budget (double-buffered inputs + scratch) ----------
    isz = jnp.dtype(cd).itemsize
    vmem_bytes = (
        2 * Bp * (HW + 2 * W + 2) * 4        # resident flat image
        + 2 * 2 * HW * 4                     # masks
        + 2 * TK * Hpad * isz                # streamed w1 K-tiles
        + 2 * (Hpad + Opad) * 4              # biases
        + 2 * Hpad * Opad * isz              # w2
        + 2 * Bp * Opad * 4                  # output
        + C_OUT * Bp * HW * isz              # feat scratch
        + Bp * Hpad * 4                      # hidden accumulator
    )
    vmem_limit = min(max(int(vmem_bytes * 1.5) + (4 << 20), 16 << 20), 64 << 20)

    kernel = functools.partial(fused_dqn_kernel, Bp=Bp, W=W, HW=HW)
    q_pad = pl.pallas_call(
        kernel,
        out_shape=jax.ShapeDtypeStruct((Bp, Opad), jnp.float32),
        grid=(nk,),
        in_specs=[
            pl.BlockSpec(memory_space=pltpu.MemorySpace.SMEM),       # conv weights
            pl.BlockSpec(memory_space=pltpu.MemorySpace.SMEM),       # conv bias
            pl.BlockSpec((Bp, HW + 2 * W + 2), lambda k: (0, 0)),    # flat image
            pl.BlockSpec((1, HW), lambda k: (0, 0)),                 # mask_lo
            pl.BlockSpec((1, HW), lambda k: (0, 0)),                 # mask_hi
            pl.BlockSpec((TK, Hpad), lambda k: (k, 0)),              # w1 K-tiles
            pl.BlockSpec((1, Hpad), lambda k: (0, 0)),               # b1
            pl.BlockSpec((Hpad, Opad), lambda k: (0, 0)),            # w2
            pl.BlockSpec((1, Opad), lambda k: (0, 0)),               # b2
        ],
        out_specs=pl.BlockSpec((Bp, Opad), lambda k: (0, 0)),
        scratch_shapes=[
            pltpu.VMEM((C_OUT, Bp, HW), cd),         # conv features (flatten order)
            pltpu.VMEM((Bp, Hpad), jnp.float32),     # hidden accumulator
        ],
        compiler_params=pltpu.CompilerParams(
            dimension_semantics=("arbitrary",),      # K reduction axis
            vmem_limit_bytes=vmem_limit,
        ),
    )(conv_w.reshape(-1).astype(jnp.float32), conv_b.astype(jnp.float32),
      x_flat, mask_lo, mask_hi, w1_p, b1_p, w2_p, b2_p)

    return q_pad[:B, :out_dim]


def init_params(key, H, W, hidden_dim, output_dim):
    # The module hard-codes Linear(19200, hidden) (80x80x3); the linear in-dim
    # is derived consistently as C_OUT*H*W so small test shapes also work.
    F = C_OUT * H * W
    k = jax.random.split(key, 6)
    params = {
        "conv_w": jax.random.normal(k[0], (C_OUT, KSIZE, KSIZE), jnp.float32) * 0.2,
        "conv_b": jax.random.normal(k[1], (C_OUT,), jnp.float32) * 0.05,
        "w1": jax.random.normal(k[2], (F, hidden_dim), jnp.float32) * (1.0 / jnp.sqrt(F)),
        "b1": jax.random.normal(k[3], (hidden_dim,), jnp.float32) * 0.05,
        "w2": jax.random.normal(k[4], (hidden_dim, output_dim), jnp.float32)
              * (1.0 / jnp.sqrt(hidden_dim)),
        "b2": jax.random.normal(k[5], (output_dim,), jnp.float32) * 0.05,
    }
    return params


def dqn_reference(x, params):
    """Pure-JAX reference (eval-mode forward) for correctness checking."""
    w = params["conv_w"][:, None, :, :]   # [O, I=1, kh, kw]
    y = jax.lax.conv_general_dilated(
        x.astype(jnp.float32), w, window_strides=(1, 1), padding=((1, 1), (1, 1)),
        dimension_numbers=("NCHW", "OIHW", "NCHW"))
    y = jnp.maximum(y + params["conv_b"][None, :, None, None], 0.0)
    f = y.reshape(x.shape[0], -1)
    h = jnp.maximum(f @ params["w1"] + params["b1"], 0.0)
    return jnp.maximum(h @ params["w2"] + params["b2"], 0.0)


if __name__ == "__main__":
    B, H, W = 2, 16, 16
    hidden_dim, output_dim = 32, 4

    key = jax.random.PRNGKey(0)
    kx, kp = jax.random.split(key)
    x = jax.random.normal(kx, (B, 1, H, W), jnp.float32)   # NCHW, in_channels=1
    params = init_params(kp, H, W, hidden_dim, output_dim)

    q_ref = dqn_reference(x, params)

    # f32 path: tight check against the pure-JAX reference.
    q = jax.block_until_ready(dqn_forward(x, params, compute_dtype=jnp.float32))
    assert q.shape == (B, output_dim)
    assert jnp.allclose(q, q_ref, atol=1e-4, rtol=1e-4), "f32 mismatch vs reference"

    # bf16 weight/activation path (halves w1 HBM traffic): looser tolerance.
    q_bf = jax.block_until_ready(dqn_forward(x, params, compute_dtype=jnp.bfloat16))
    assert q_bf.shape == (B, output_dim)
    assert jnp.allclose(q_bf, q_ref, atol=5e-2, rtol=5e-2), "bf16 mismatch vs reference"

    print("KERNEL_OK")
</pallas_src>

<mosaic_0001>
module attributes {stable_mosaic.version = 11 : i64} {
  func.func @fused_dqn_kernel(%arg0: i32, %arg1: memref<27xf32, #tpu.memory_space<smem>>, %arg2: memref<3xf32, #tpu.memory_space<smem>>, %arg3: memref<8x290xf32, #tpu.memory_space<vmem>>, %arg4: memref<1x256xf32, #tpu.memory_space<vmem>>, %arg5: memref<1x256xf32, #tpu.memory_space<vmem>>, %arg6: memref<256x128xf32, #tpu.memory_space<vmem>>, %arg7: memref<1x128xf32, #tpu.memory_space<vmem>>, %arg8: memref<128x128xf32, #tpu.memory_space<vmem>>, %arg9: memref<1x128xf32, #tpu.memory_space<vmem>>, %arg10: memref<8x128xf32, #tpu.memory_space<vmem>>, %arg11: memref<3x8x256xf32, #tpu.memory_space<vmem>>, %arg12: memref<8x128xf32, #tpu.memory_space<vmem>>) attributes {dimension_semantics = [#tpu.dimension_semantics<arbitrary>], iteration_bounds = array<i64: 3>, scalar_prefetch = 0 : i64, scratch_operands = 2 : i64, tpu.core_type = #tpu.core_type<tc>, window_params = [{transform_indices = @transform_0, window_bounds = array<i64: 27>}, {transform_indices = @transform_1, window_bounds = array<i64: 3>}, {pipeline_mode = #tpu.pipeline_mode<synchronous>, transform_indices = @transform_2, window_bounds = array<i64: 8, 290>}, {pipeline_mode = #tpu.pipeline_mode<synchronous>, transform_indices = @transform_3, window_bounds = array<i64: 1, 256>}, {pipeline_mode = #tpu.pipeline_mode<synchronous>, transform_indices = @transform_4, window_bounds = array<i64: 1, 256>}, {transform_indices = @transform_5, window_bounds = array<i64: 256, 128>}, {pipeline_mode = #tpu.pipeline_mode<synchronous>, transform_indices = @transform_6, window_bounds = array<i64: 1, 128>}, {pipeline_mode = #tpu.pipeline_mode<synchronous>, transform_indices = @transform_7, window_bounds = array<i64: 128, 128>}, {pipeline_mode = #tpu.pipeline_mode<synchronous>, transform_indices = @transform_8, window_bounds = array<i64: 1, 128>}, {pipeline_mode = #tpu.pipeline_mode<synchronous>, transform_indices = @transform_9, window_bounds = array<i64: 8, 128>}]} {
    %c0_i32 = arith.constant 0 : i32
    %0 = arith.cmpi eq, %arg0, %c0_i32 : i32
    %1 = arith.extui %0 : i1 to i32
    %c0_i32_0 = arith.constant 0 : i32
    %2 = arith.cmpi ne, %1, %c0_i32_0 : i32
    scf.if %2 {
      %c0_9 = arith.constant 0 : index
      %c0_10 = arith.constant 0 : index
      %14 = vector.load %arg3[%c0_9, %c0_10] : memref<8x290xf32, #tpu.memory_space<vmem>>, vector<8x290xf32>
      %c0_11 = arith.constant 0 : index
      %c0_12 = arith.constant 0 : index
      %15 = vector.load %arg4[%c0_11, %c0_12] : memref<1x256xf32, #tpu.memory_space<vmem>>, vector<1x256xf32>
      %c0_13 = arith.constant 0 : index
      %c0_14 = arith.constant 0 : index
      %16 = vector.load %arg5[%c0_13, %c0_14] : memref<1x256xf32, #tpu.memory_space<vmem>>, vector<1x256xf32>
      %17 = vector.extract_strided_slice %14 {offsets = [0, 0], sizes = [8, 256], strides = [1, 1]} : vector<8x290xf32> to vector<8x256xf32>
      %18 = vector.broadcast %15 : vector<1x256xf32> to vector<8x256xf32>
      %19 = arith.mulf %17, %18 : vector<8x256xf32>
      %20 = vector.extract_strided_slice %14 {offsets = [0, 1], sizes = [8, 256], strides = [1, 1]} : vector<8x290xf32> to vector<8x256xf32>
      %21 = vector.extract_strided_slice %14 {offsets = [0, 2], sizes = [8, 256], strides = [1, 1]} : vector<8x290xf32> to vector<8x256xf32>
      %22 = vector.broadcast %16 : vector<1x256xf32> to vector<8x256xf32>
      %23 = arith.mulf %21, %22 : vector<8x256xf32>
      %24 = vector.extract_strided_slice %14 {offsets = [0, 16], sizes = [8, 256], strides = [1, 1]} : vector<8x290xf32> to vector<8x256xf32>
      %25 = vector.broadcast %15 : vector<1x256xf32> to vector<8x256xf32>
      %26 = arith.mulf %24, %25 : vector<8x256xf32>
      %27 = vector.extract_strided_slice %14 {offsets = [0, 17], sizes = [8, 256], strides = [1, 1]} : vector<8x290xf32> to vector<8x256xf32>
      %28 = vector.extract_strided_slice %14 {offsets = [0, 18], sizes = [8, 256], strides = [1, 1]} : vector<8x290xf32> to vector<8x256xf32>
      %29 = vector.broadcast %16 : vector<1x256xf32> to vector<8x256xf32>
      %30 = arith.mulf %28, %29 : vector<8x256xf32>
      %31 = vector.extract_strided_slice %14 {offsets = [0, 32], sizes = [8, 256], strides = [1, 1]} : vector<8x290xf32> to vector<8x256xf32>
      %32 = vector.broadcast %15 : vector<1x256xf32> to vector<8x256xf32>
      %33 = arith.mulf %31, %32 : vector<8x256xf32>
      %34 = vector.extract_strided_slice %14 {offsets = [0, 33], sizes = [8, 256], strides = [1, 1]} : vector<8x290xf32> to vector<8x256xf32>
      %35 = vector.extract_strided_slice %14 {offsets = [0, 34], sizes = [8, 256], strides = [1, 1]} : vector<8x290xf32> to vector<8x256xf32>
      %36 = vector.broadcast %16 : vector<1x256xf32> to vector<8x256xf32>
      %37 = arith.mulf %35, %36 : vector<8x256xf32>
      %c0_15 = arith.constant 0 : index
      %38 = memref.load %arg2[%c0_15] : memref<3xf32, #tpu.memory_space<smem>>
      %39 = vector.broadcast %38 : f32 to vector<8x256xf32>
      %c0_16 = arith.constant 0 : index
      %40 = memref.load %arg1[%c0_16] : memref<27xf32, #tpu.memory_space<smem>>
      %41 = vector.broadcast %40 : f32 to vector<8x256xf32>
      %42 = arith.mulf %41, %19 : vector<8x256xf32>
      %43 = arith.addf %39, %42 : vector<8x256xf32>
      %c1 = arith.constant 1 : index
      %44 = memref.load %arg1[%c1] : memref<27xf32, #tpu.memory_space<smem>>
      %45 = vector.broadcast %44 : f32 to vector<8x256xf32>
      %46 = arith.mulf %45, %20 : vector<8x256xf32>
      %47 = arith.addf %43, %46 : vector<8x256xf32>
      %c2 = arith.constant 2 : index
      %48 = memref.load %arg1[%c2] : memref<27xf32, #tpu.memory_space<smem>>
      %49 = vector.broadcast %48 : f32 to vector<8x256xf32>
      %50 = arith.mulf %49, %23 : vector<8x256xf32>
      %51 = arith.addf %47, %50 : vector<8x256xf32>
      %c3 = arith.constant 3 : index
      %52 = memref.load %arg1[%c3] : memref<27xf32, #tpu.memory_space<smem>>
      %53 = vector.broadcast %52 : f32 to vector<8x256xf32>
      %54 = arith.mulf %53, %26 : vector<8x256xf32>
      %55 = arith.addf %51, %54 : vector<8x256xf32>
      %c4 = arith.constant 4 : index
      %56 = memref.load %arg1[%c4] : memref<27xf32, #tpu.memory_space<smem>>
      %57 = vector.broadcast %56 : f32 to vector<8x256xf32>
      %58 = arith.mulf %57, %27 : vector<8x256xf32>
      %59 = arith.addf %55, %58 : vector<8x256xf32>
      %c5 = arith.constant 5 : index
      %60 = memref.load %arg1[%c5] : memref<27xf32, #tpu.memory_space<smem>>
      %61 = vector.broadcast %60 : f32 to vector<8x256xf32>
      %62 = arith.mulf %61, %30 : vector<8x256xf32>
      %63 = arith.addf %59, %62 : vector<8x256xf32>
      %c6 = arith.constant 6 : index
      %64 = memref.load %arg1[%c6] : memref<27xf32, #tpu.memory_space<smem>>
      %65 = vector.broadcast %64 : f32 to vector<8x256xf32>
      %66 = arith.mulf %65, %33 : vector<8x256xf32>
      %67 = arith.addf %63, %66 : vector<8x256xf32>
      %c7 = arith.constant 7 : index
      %68 = memref.load %arg1[%c7] : memref<27xf32, #tpu.memory_space<smem>>
      %69 = vector.broadcast %68 : f32 to vector<8x256xf32>
      %70 = arith.mulf %69, %34 : vector<8x256xf32>
      %71 = arith.addf %67, %70 : vector<8x256xf32>
      %c8 = arith.constant 8 : index
      %72 = memref.load %arg1[%c8] : memref<27xf32, #tpu.memory_space<smem>>
      %73 = vector.broadcast %72 : f32 to vector<8x256xf32>
      %74 = arith.mulf %73, %37 : vector<8x256xf32>
      %75 = arith.addf %71, %74 : vector<8x256xf32>
      %cst_17 = arith.constant 0.000000e+00 : f32
      %76 = vector.broadcast %cst_17 : f32 to vector<8x256xf32>
      %77 = arith.maximumf %75, %76 : vector<8x256xf32>
      %c0_18 = arith.constant 0 : index
      %c0_19 = arith.constant 0 : index
      %c0_20 = arith.constant 0 : index
      %78 = vector.load %arg11[%c0_18, %c0_19, %c0_20] : memref<3x8x256xf32, #tpu.memory_space<vmem>>, vector<1x8x256xf32>
      %79 = vector.shape_cast %78 : vector<1x8x256xf32> to vector<8x256xf32>
      %80 = vector.shape_cast %77 : vector<8x256xf32> to vector<1x8x256xf32>
      tpu.vector_store %arg11[%c0_18, %c0_19, %c0_20], %80 {strides = array<i32>} : memref<3x8x256xf32, #tpu.memory_space<vmem>>, vector<1x8x256xf32>,
      %c1_21 = arith.constant 1 : index
      %81 = memref.load %arg2[%c1_21] : memref<3xf32, #tpu.memory_space<smem>>
      %82 = vector.broadcast %81 : f32 to vector<8x256xf32>
      %c9 = arith.constant 9 : index
      %83 = memref.load %arg1[%c9] : memref<27xf32, #tpu.memory_space<smem>>
      %84 = vector.broadcast %83 : f32 to vector<8x256xf32>
      %85 = arith.mulf %84, %19 : vector<8x256xf32>
      %86 = arith.addf %82, %85 : vector<8x256xf32>
      %c10 = arith.constant 10 : index
      %87 = memref.load %arg1[%c10] : memref<27xf32, #tpu.memory_space<smem>>
      %88 = vector.broadcast %87 : f32 to vector<8x256xf32>
      %89 = arith.mulf %88, %20 : vector<8x256xf32>
      %90 = arith.addf %86, %89 : vector<8x256xf32>
      %c11 = arith.constant 11 : index
      %91 = memref.load %arg1[%c11] : memref<27xf32, #tpu.memory_space<smem>>
      %92 = vector.broadcast %91 : f32 to vector<8x256xf32>
      %93 = arith.mulf %92, %23 : vector<8x256xf32>
      %94 = arith.addf %90, %93 : vector<8x256xf32>
      %c12 = arith.constant 12 : index
      %95 = memref.load %arg1[%c12] : memref<27xf32, #tpu.memory_space<smem>>
      %96 = vector.broadcast %95 : f32 to vector<8x256xf32>
      %97 = arith.mulf %96, %26 : vector<8x256xf32>
      %98 = arith.addf %94, %97 : vector<8x256xf32>
      %c13 = arith.constant 13 : index
      %99 = memref.load %arg1[%c13] : memref<27xf32, #tpu.memory_space<smem>>
      %100 = vector.broadcast %99 : f32 to vector<8x256xf32>
      %101 = arith.mulf %100, %27 : vector<8x256xf32>
      %102 = arith.addf %98, %101 : vector<8x256xf32>
      %c14 = arith.constant 14 : index
      %103 = memref.load %arg1[%c14] : memref<27xf32, #tpu.memory_space<smem>>
      %104 = vector.broadcast %103 : f32 to vector<8x256xf32>
      %105 = arith.mulf %104, %30 : vector<8x256xf32>
      %106 = arith.addf %102, %105 : vector<8x256xf32>
      %c15 = arith.constant 15 : index
      %107 = memref.load %arg1[%c15] : memref<27xf32, #tpu.memory_space<smem>>
      %108 = vector.broadcast %107 : f32 to vector<8x256xf32>
      %109 = arith.mulf %108, %33 : vector<8x256xf32>
      %110 = arith.addf %106, %109 : vector<8x256xf32>
      %c16 = arith.constant 16 : index
      %111 = memref.load %arg1[%c16] : memref<27xf32, #tpu.memory_space<smem>>
      %112 = vector.broadcast %111 : f32 to vector<8x256xf32>
      %113 = arith.mulf %112, %34 : vector<8x256xf32>
      %114 = arith.addf %110, %113 : vector<8x256xf32>
      %c17 = arith.constant 17 : index
      %115 = memref.load %arg1[%c17] : memref<27xf32, #tpu.memory_space<smem>>
      %116 = vector.broadcast %115 : f32 to vector<8x256xf32>
      %117 = arith.mulf %116, %37 : vector<8x256xf32>
      %118 = arith.addf %114, %117 : vector<8x256xf32>
      %cst_22 = arith.constant 0.000000e+00 : f32
      %119 = vector.broadcast %cst_22 : f32 to vector<8x256xf32>
      %120 = arith.maximumf %118, %119 : vector<8x256xf32>
      %c1_23 = arith.constant 1 : index
      %c0_24 = arith.constant 0 : index
      %c0_25 = arith.constant 0 : index
      %121 = vector.load %arg11[%c1_23, %c0_24, %c0_25] : memref<3x8x256xf32, #tpu.memory_space<vmem>>, vector<1x8x256xf32>
      %122 = vector.shape_cast %121 : vector<1x8x256xf32> to vector<8x256xf32>
      %123 = vector.shape_cast %120 : vector<8x256xf32> to vector<1x8x256xf32>
      tpu.vector_store %arg11[%c1_23, %c0_24, %c0_25], %123 {strides = array<i32>} : memref<3x8x256xf32, #tpu.memory_space<vmem>>, vector<1x8x256xf32>,
      %c2_26 = arith.constant 2 : index
      %124 = memref.load %arg2[%c2_26] : memref<3xf32, #tpu.memory_space<smem>>
      %125 = vector.broadcast %124 : f32 to vector<8x256xf32>
      %c18 = arith.constant 18 : index
      %126 = memref.load %arg1[%c18] : memref<27xf32, #tpu.memory_space<smem>>
      %127 = vector.broadcast %126 : f32 to vector<8x256xf32>
      %128 = arith.mulf %127, %19 : vector<8x256xf32>
      %129 = arith.addf %125, %128 : vector<8x256xf32>
      %c19 = arith.constant 19 : index
      %130 = memref.load %arg1[%c19] : memref<27xf32, #tpu.memory_space<smem>>
      %131 = vector.broadcast %130 : f32 to vector<8x256xf32>
      %132 = arith.mulf %131, %20 : vector<8x256xf32>
      %133 = arith.addf %129, %132 : vector<8x256xf32>
      %c20 = arith.constant 20 : index
      %134 = memref.load %arg1[%c20] : memref<27xf32, #tpu.memory_space<smem>>
      %135 = vector.broadcast %134 : f32 to vector<8x256xf32>
      %136 = arith.mulf %135, %23 : vector<8x256xf32>
      %137 = arith.addf %133, %136 : vector<8x256xf32>
      %c21 = arith.constant 21 : index
      %138 = memref.load %arg1[%c21] : memref<27xf32, #tpu.memory_space<smem>>
      %139 = vector.broadcast %138 : f32 to vector<8x256xf32>
      %140 = arith.mulf %139, %26 : vector<8x256xf32>
      %141 = arith.addf %137, %140 : vector<8x256xf32>
      %c22 = arith.constant 22 : index
      %142 = memref.load %arg1[%c22] : memref<27xf32, #tpu.memory_space<smem>>
      %143 = vector.broadcast %142 : f32 to vector<8x256xf32>
      %144 = arith.mulf %143, %27 : vector<8x256xf32>
      %145 = arith.addf %141, %144 : vector<8x256xf32>
      %c23 = arith.constant 23 : index
      %146 = memref.load %arg1[%c23] : memref<27xf32, #tpu.memory_space<smem>>
      %147 = vector.broadcast %146 : f32 to vector<8x256xf32>
      %148 = arith.mulf %147, %30 : vector<8x256xf32>
      %149 = arith.addf %145, %148 : vector<8x256xf32>
      %c24 = arith.constant 24 : index
      %150 = memref.load %arg1[%c24] : memref<27xf32, #tpu.memory_space<smem>>
      %151 = vector.broadcast %150 : f32 to vector<8x256xf32>
      %152 = arith.mulf %151, %33 : vector<8x256xf32>
      %153 = arith.addf %149, %152 : vector<8x256xf32>
      %c25 = arith.constant 25 : index
      %154 = memref.load %arg1[%c25] : memref<27xf32, #tpu.memory_space<smem>>
      %155 = vector.broadcast %154 : f32 to vector<8x256xf32>
      %156 = arith.mulf %155, %34 : vector<8x256xf32>
      %157 = arith.addf %153, %156 : vector<8x256xf32>
      %c26 = arith.constant 26 : index
      %158 = memref.load %arg1[%c26] : memref<27xf32, #tpu.memory_space<smem>>
      %159 = vector.broadcast %158 : f32 to vector<8x256xf32>
      %160 = arith.mulf %159, %37 : vector<8x256xf32>
      %161 = arith.addf %157, %160 : vector<8x256xf32>
      %cst_27 = arith.constant 0.000000e+00 : f32
      %162 = vector.broadcast %cst_27 : f32 to vector<8x256xf32>
      %163 = arith.maximumf %161, %162 : vector<8x256xf32>
      %c2_28 = arith.constant 2 : index
      %c0_29 = arith.constant 0 : index
      %c0_30 = arith.constant 0 : index
      %164 = vector.load %arg11[%c2_28, %c0_29, %c0_30] : memref<3x8x256xf32, #tpu.memory_space<vmem>>, vector<1x8x256xf32>
      %165 = vector.shape_cast %164 : vector<1x8x256xf32> to vector<8x256xf32>
      %166 = vector.shape_cast %163 : vector<8x256xf32> to vector<1x8x256xf32>
      tpu.vector_store %arg11[%c2_28, %c0_29, %c0_30], %166 {strides = array<i32>} : memref<3x8x256xf32, #tpu.memory_space<vmem>>, vector<1x8x256xf32>,
      %cst_31 = arith.constant 0.000000e+00 : f32
      %167 = vector.broadcast %cst_31 : f32 to vector<8x128xf32>
      %c0_32 = arith.constant 0 : index
      %c0_33 = arith.constant 0 : index
      %168 = vector.load %arg7[%c0_32, %c0_33] : memref<1x128xf32, #tpu.memory_space<vmem>>, vector<1x128xf32>
      %169 = vector.broadcast %168 : vector<1x128xf32> to vector<8x128xf32>
      %170 = arith.addf %167, %169 : vector<8x128xf32>
      %c0_34 = arith.constant 0 : index
      %c0_35 = arith.constant 0 : index
      %171 = vector.load %arg12[%c0_34, %c0_35] : memref<8x128xf32, #tpu.memory_space<vmem>>, vector<8x128xf32>
      tpu.vector_store %arg12[%c0_34, %c0_35], %170 {strides = array<i32>} : memref<8x128xf32, #tpu.memory_space<vmem>>, vector<8x128xf32>,
    } else {
    }
    %c0 = arith.constant 0 : index
    %c0_1 = arith.constant 0 : index
    %3 = vector.load %arg12[%c0, %c0_1] : memref<8x128xf32, #tpu.memory_space<vmem>>, vector<8x128xf32>
    %4 = arith.index_cast %arg0 : i32 to index
    %c0_2 = arith.constant 0 : index
    %c0_3 = arith.constant 0 : index
    %5 = vector.load %arg11[%4, %c0_2, %c0_3] : memref<3x8x256xf32, #tpu.memory_space<vmem>>, vector<1x8x256xf32>
    %6 = vector.shape_cast %5 : vector<1x8x256xf32> to vector<8x256xf32>
    %c0_4 = arith.constant 0 : index
    %c0_5 = arith.constant 0 : index
    %7 = vector.load %arg6[%c0_4, %c0_5] : memref<256x128xf32, #tpu.memory_space<vmem>>, vector<256x128xf32>
    %cst = arith.constant dense<0.000000e+00> : vector<8x128xf32>
    %8 = tpu.matmul %6, %7, %cst {dimension_numbers = #tpu.dot_dimension_numbers<[1], [0], [0], [1], [0, 0, 1, 1], [], []>} : vector<8x256xf32>, vector<256x128xf32>, vector<8x128xf32> -> vector<8x128xf32>
    %9 = arith.addf %3, %8 : vector<8x128xf32>
    %c0_6 = arith.constant 0 : index
    %c0_7 = arith.constant 0 : index
    %10 = vector.load %arg12[%c0_6, %c0_7] : memref<8x128xf32, #tpu.memory_space<vmem>>, vector<8x128xf32>
    tpu.vector_store %arg12[%c0_6, %c0_7], %9 {strides = array<i32>} : memref<8x128xf32, #tpu.memory_space<vmem>>, vector<8x128xf32>,
    %c2_i32 = arith.constant 2 : i32
    %11 = arith.cmpi eq, %arg0, %c2_i32 : i32
    %12 = arith.extui %11 : i1 to i32
    %c0_i32_8 = arith.constant 0 : i32
    %13 = arith.cmpi ne, %12, %c0_i32_8 : i32
    scf.if %13 {
      %c0_9 = arith.constant 0 : index
      %c0_10 = arith.constant 0 : index
      %14 = vector.load %arg12[%c0_9, %c0_10] : memref<8x128xf32, #tpu.memory_space<vmem>>, vector<8x128xf32>
      %cst_11 = arith.constant 0.000000e+00 : f32
      %15 = vector.broadcast %cst_11 : f32 to vector<8x128xf32>
      %16 = arith.maximumf %14, %15 : vector<8x128xf32>
      %c0_12 = arith.constant 0 : index
      %c0_13 = arith.constant 0 : index
      %17 = vector.load %arg8[%c0_12, %c0_13] : memref<128x128xf32, #tpu.memory_space<vmem>>, vector<128x128xf32>
      %cst_14 = arith.constant dense<0.000000e+00> : vector<8x128xf32>
      %18 = tpu.matmul %16, %17, %cst_14 {dimension_numbers = #tpu.dot_dimension_numbers<[1], [0], [0], [1], [0, 0, 1, 1], [], []>} : vector<8x128xf32>, vector<128x128xf32>, vector<8x128xf32> -> vector<8x128xf32>
      %c0_15 = arith.constant 0 : index
      %c0_16 = arith.constant 0 : index
      %19 = vector.load %arg9[%c0_15, %c0_16] : memref<1x128xf32, #tpu.memory_space<vmem>>, vector<1x128xf32>
      %20 = vector.broadcast %19 : vector<1x128xf32> to vector<8x128xf32>
      %21 = arith.addf %18, %20 : vector<8x128xf32>
      %cst_17 = arith.constant 0.000000e+00 : f32
      %22 = vector.broadcast %cst_17 : f32 to vector<8x128xf32>
      %23 = arith.maximumf %21, %22 : vector<8x128xf32>
      %c0_18 = arith.constant 0 : index
      %c0_19 = arith.constant 0 : index
      %24 = vector.load %arg10[%c0_18, %c0_19] : memref<8x128xf32, #tpu.memory_space<vmem>>, vector<8x128xf32>
      tpu.vector_store %arg10[%c0_18, %c0_19], %23 {strides = array<i32>} : memref<8x128xf32, #tpu.memory_space<vmem>>, vector<8x128xf32>,
    } else {
    }
    return
  }
  func.func @transform_0(%arg0: i32) -> i32 {
    %c0_i32 = arith.constant 0 : i32
    %c0_i32_0 = arith.constant 0 : i32
    return %c0_i32 : i32
  }
  func.func @transform_1(%arg0: i32) -> i32 {
    %c0_i32 = arith.constant 0 : i32
    %c0_i32_0 = arith.constant 0 : i32
    return %c0_i32 : i32
  }
  func.func @transform_2(%arg0: i32) -> (i32, i32) {
    %c0_i32 = arith.constant 0 : i32
    %c0_i32_0 = arith.constant 0 : i32
    %c0_i32_1 = arith.constant 0 : i32
    return %c0_i32, %c0_i32_0 : i32, i32
  }
  func.func @transform_3(%arg0: i32) -> (i32, i32) {
    %c0_i32 = arith.constant 0 : i32
    %c0_i32_0 = arith.constant 0 : i32
    %c0_i32_1 = arith.constant 0 : i32
    return %c0_i32, %c0_i32_0 : i32, i32
  }
  func.func @transform_4(%arg0: i32) -> (i32, i32) {
    %c0_i32 = arith.constant 0 : i32
    %c0_i32_0 = arith.constant 0 : i32
    %c0_i32_1 = arith.constant 0 : i32
    return %c0_i32, %c0_i32_0 : i32, i32
  }
  func.func @transform_5(%arg0: i32) -> (i32, i32) {
    %c0_i32 = arith.constant 0 : i32
    %c0_i32_0 = arith.constant 0 : i32
    return %arg0, %c0_i32 : i32, i32
  }
  func.func @transform_6(%arg0: i32) -> (i32, i32) {
    %c0_i32 = arith.constant 0 : i32
    %c0_i32_0 = arith.constant 0 : i32
    %c0_i32_1 = arith.constant 0 : i32
    return %c0_i32, %c0_i32_0 : i32, i32
  }
  func.func @transform_7(%arg0: i32) -> (i32, i32) {
    %c0_i32 = arith.constant 0 : i32
    %c0_i32_0 = arith.constant 0 : i32
    %c0_i32_1 = arith.constant 0 : i32
    return %c0_i32, %c0_i32_0 : i32, i32
  }
  func.func @transform_8(%arg0: i32) -> (i32, i32) {
    %c0_i32 = arith.constant 0 : i32
    %c0_i32_0 = arith.constant 0 : i32
    %c0_i32_1 = arith.constant 0 : i32
    return %c0_i32, %c0_i32_0 : i32, i32
  }
  func.func @transform_9(%arg0: i32) -> (i32, i32) {
    %c0_i32 = arith.constant 0 : i32
    %c0_i32_0 = arith.constant 0 : i32
    %c0_i32_1 = arith.constant 0 : i32
    return %c0_i32, %c0_i32_0 : i32, i32
  }
}

</mosaic_0001>

<bundles_post_ra>
// kernel: tpu_custom_call.1
= control target key start
LH: loop header
LB: loop body
LE: loop exit
PB: predicated region body
PF: predicated region fallthrough
CT: control target
= control target key end

     0   :  { %s2619_s0 = inlined_call_operand.hbm [shape: f32[27], index: 0, kind: input, shape index: {}]   ;;  %s2620_s1 = inlined_call_operand.vmem [shape: f32[3], index: 1, kind: input, shape index: {}]   ;;  %s2621_s2 = inlined_call_operand.hbm [shape: f32[8,290], index: 2, kind: input, shape index: {}]   ;;  %s2622_s3 = inlined_call_operand.vmem [shape: f32[1,256], index: 3, kind: input, shape index: {}]   ;;  %s2623_s4 = inlined_call_operand.vmem [shape: f32[1,256], index: 4, kind: input, shape index: {}]   ;;  %s2624_s5 = inlined_call_operand.hbm [shape: f32[768,128], index: 5, kind: input, shape index: {}]   ;;  %s2625_s6 = inlined_call_operand.vmem [shape: f32[1,128], index: 6, kind: input, shape index: {}]   ;;  %s2626_s7 = inlined_call_operand.hbm [shape: f32[128,128], index: 7, kind: input, shape index: {}]   ;;  %s2627_s8 = inlined_call_operand.vmem [shape: f32[1,128], index: 8, kind: input, shape index: {}]   ;;  %s2628_s9 = inlined_call_operand.hbm [shape: f32[8,128], index: 9, kind: output, shape index: {}]  }
   0x1   :  { %2632 = sst [smem:[#allocation21_spill]] %s2620_s1 }
   0x2   :  { %14 = vsyncpa [#allocation7], 0 }
   0x3   :  { %15 = vsyncpa [#allocation8], 0 }
   0x4   :  { %16 = vsyncpa [#allocation5], 0 }
   0x5   :  { %17 = vsyncpa [#allocation12], 0 }
   0x6   :  { %19 = vsyncpa [#allocation12 + $0x1], 0 }
   0x7   :  { %20 = vsyncpa [#allocation6], 0  ;;  %s1907_s30 = smov 0   ;;  %s1909_s10 = smov 0  }
   0x8   :  { %s1911_s11 = smov 0   ;;  %s1913_s12 = smov 0  }
   0x9 LB: > { %s1926_s13 = sadd.s32 4294967295, %s1831_s12   ;;  %p151_p0 = scmp.ne.s32.totalorder %s1823_s10, %s1819_s30  ;;  %s1831_s12 = sphi %s1913_s12, %s2653_s12   ;;  %s1827_s11 = sphi %s1911_s11, %s2652_s11   ;;  %s1823_s10 = sphi %s1909_s10, %s2651_s10   ;;  %s1819_s30 = sphi %s1907_s30, %s2650_s30  }
   0xa   : > { %p2629_p1 = scmp.eq.s32.totalorder %s1926_s13, 0  ;;  %p1334_p2 = scmp.ge.s32.totalorder %s1831_s12, 1 }
   0xb   : > { %p246_p3 = scmp.lt.s32.totalorder %s1831_s12, 4  ;;  %s1833_s16 = smov [#allocation13]  }
   0xc   : > { %p1935_p5 = por %p2629_p1, %p151_p0  ;;  %s298_s17 = sshll.u32 %s1833_s16, 4  ;;  %s299_s17 = int_to_ptr.vmem [resolvable:$true] %s298_s17 }
   0xd   : > { %p1939_p6 = pnand %p1334_p2, %p246_p3  ;;  %s2636_s1 = sld [smem:[#allocation21_spill]] }
   0xe   : > { %s2633_s14 = scalar_select %p1935_p5, 1, 0 }
   0xf   : > { %s2634_s15 = scalar_select %p1939_p6, 1, 0 }
  0x10   : > { %p1554_p7 = pneg %p1939_p6  ;;  %s1637_s24 = scalar_lea.hbm %s2626_s7, 2048 }
  0x11   : > { %p1638_p9 = scmp.ne.s32.totalorder %s2626_s7, %s1637_s24  ;;  %p1644_p13 = scmp.lt.u32.totalorder %s1637_s24, %s2626_s7 }
  0x12   : > { %p1947_p8 = pnand %p1554_p7, %p2629_p1 }
  0x13   : > { %s268_s21 = sshll.u32 %s2636_s1, 4  ;;  %s1954_s21 = int_to_ptr.vmem [resolvable:$true] %s268_s21 }
  0x14   : > { %p1964_p10 = pneg %p1947_p8 }
  0x16   : > { %p1640_p11 = pnand %p1964_p10, %p1638_p9 }
  0x18   : > { %p1641_p12 = pneg %p1640_p11 }
  0x1a   : > { %p1646_p0 = pnand %p1644_p13, %p1641_p12 }
  0x1c   : > { %1649 = shalt.err (!%p1646_p0)
}
  0x1d   : > { %s1650_s30 = scalar_lea.vmem %s299_s17, 2048  ;;  %p1658_p4 = scmp.lt.s32.totalorder %s299_s17, %s299_s17 }
  0x1e   : > { %p1651_p2 = scmp.ne.s32.totalorder %s299_s17, %s1650_s30  ;;  %p1659_p1 = scmp.lt.s32.totalorder %s1650_s30, %s1650_s30 }
  0x20   : > { %p1653_p3 = pnand %p1651_p2, %p1964_p10  ;;  %p1660_p5 = por %p1659_p1, %p1658_p4 }
  0x22   : > { %p1654_p7 = pneg %p1653_p3 }
  0x24   : > { %p1661_p6 = pnand %p1660_p5, %p1654_p7 }
  0x26   : > { %1664 = shalt.err (!%p1661_p6)
}
  0x27   : > { %s1834_s16 = smov 128   ;;  %s1835_s19 = smov 8  }
  0x28   : > { %1566 = dma.hbm_to_vmem [thread:$0]  (!%p1947_p8), %s2626_s7, 2048, %s299_s17, [#allocation12], %s1834_s16, %s1834_s16, %s1835_s19  }
  0x29   : > { %s1665_s25 = scalar_lea.hbm %s2619_s0, 16 }
  0x2a   : > { %p1666_p1 = scmp.ne.s32.totalorder %s2619_s0, %s1665_s25  ;;  %p1672_p6 = scmp.lt.u32.totalorder %s1665_s25, %s2619_s0 }
  0x2c   : > { %p1668_p4 = pnand %p1666_p1, %p1964_p10 }
  0x2e   : > { %p1669_p5 = pneg %p1668_p4 }
  0x30   : > { %p1674_p9 = pnand %p1672_p6, %p1669_p5 }
  0x32   : > { %1677 = shalt.err (!%p1674_p9)
}
  0x33   : > { %s1836_s1 = smov [#allocation4]   ;;  %s1678_s22 = scalar_lea.vmem %s1954_s21, 16 }
  0x34   : > { %1557 = dma.hbm_to_smem (!%p1947_p8), %s2619_s0, 16, %s1836_s1, [#allocation7]  }
  0x35   : > { %p1679_p11 = scmp.ne.s32.totalorder %s1954_s21, %s1678_s22  ;;  %p1686_p0 = scmp.lt.s32.totalorder %s1954_s21, %s1954_s21 }
  0x36   : > { %p1687_p2 = scmp.lt.s32.totalorder %s1678_s22, %s1678_s22 }
  0x37   : > { %p1681_p12 = pnand %p1679_p11, %p1964_p10 }
  0x38   : > { %p1688_p3 = por %p1687_p2, %p1686_p0 }
  0x39   : > { %p1682_p13 = pneg %p1681_p12 }
  0x3b   : > { %p1689_p7 = pnand %p1688_p3, %p1682_p13 }
  0x3d   : > { %1692 = shalt.err (!%p1689_p7)
}
  0x3e   : > { %s1837_s23 = smov [#allocation9]   ;;  %s1838_s24 = smov [#allocation10]  }
  0x3f   : > { %1560 = dma.vmem_to_smem (!%p1947_p8), %s1954_s21, 16, %s1837_s23, [#allocation8]  }
  0x40   : > { %s279_s25 = sshll.u32 %s1838_s24, 4  ;;  %s1693_s28 = scalar_lea.hbm %s2621_s2, 384  ;;  %s280_s25 = int_to_ptr.vmem [resolvable:$true] %s279_s25 }
  0x41   : > { %p1694_p1 = scmp.ne.s32.totalorder %s2621_s2, %s1693_s28  ;;  %p1700_p6 = scmp.lt.u32.totalorder %s1693_s28, %s2621_s2 }
  0x43   : > { %p1696_p4 = pnand %p1694_p1, %p1964_p10 }
  0x45   : > { %p1697_p5 = pneg %p1696_p4 }
  0x47   : > { %p1702_p9 = pnand %p1700_p6, %p1697_p5 }
  0x49   : > { %1705 = shalt.err (!%p1702_p9)
}
  0x4a   : > { %s1706_s21 = scalar_lea.vmem %s280_s25, 384  ;;  %p1714_p0 = scmp.lt.s32.totalorder %s280_s25, %s280_s25 }
  0x4b   : > { %p1707_p11 = scmp.ne.s32.totalorder %s280_s25, %s1706_s21  ;;  %p1715_p2 = scmp.lt.s32.totalorder %s1706_s21, %s1706_s21 }
  0x4d   : > { %p1709_p12 = pnand %p1707_p11, %p1964_p10  ;;  %p1716_p3 = por %p1715_p2, %p1714_p0 }
  0x4f   : > { %p1710_p13 = pneg %p1709_p12 }
  0x51   : > { %p1717_p7 = pnand %p1716_p3, %p1710_p13 }
  0x53   : > { %1720 = shalt.err (!%p1717_p7)
}
  0x54   : > { %1563 = dma.hbm_to_vmem [thread:$0]  (!%p1947_p8), %s2621_s2, 384, %s280_s25, [#allocation5]  }
  0x55   : > { %s2027_s27 = sadd.s32 1, %s1831_s12   ;;  %s138_s24 = sadd.s32 1, %s1827_s11 }
  0x56   : > { %s135_s18 = ssub.s32 %s1831_s12, %s2027_s27  ;;  %p145_p10 = scmp.ne.s32.totalorder %s1827_s11, %s1823_s10 }
  0x57   : > { %p136_p1 = scmp.eq.s32.totalorder %s135_s18, 0  ;;  %p146_p4 = scmp.eq.s32.totalorder %s1831_s12, 0 }
  0x58   : > { %p1575_p5 = scmp.lt.s32.totalorder %s1831_s12, 3  ;;  %s315_s1 = sand.u32 1, %s1831_s12  }
  0x59   : > { %s2038_s26 = scalar_select %p136_p1, %s1827_s11, %s138_s24  }
  0x5a   : > { %p147_p6 = por %p146_p4, %p145_p10  ;;  %s317_s28 = sand.u32 1, %s1827_s11  }
  0x5b   : > { %s1387_s29 = sshll.u32 %s1831_s12, 12  ;;  %s1340_s30 = sshll.u32 %s317_s28, 8 }
  0x5c   : > { %s2045_s25 = scalar_lea.hbm %s2624_s5, %s1387_s29  ;;  %p2047_p8 = pnand %p1575_p5, %p147_p6 }
  0x5d   : > { %s319_s22 = scalar_lea.vmem [#allocation11], %s1340_s30  ;;  %s2053_s12 = scalar_lea.sflag [#allocation12], %s315_s1 }
  0x5e   : > { %s326_s23 = sshll.u32 %s319_s22, 4  ;;  %s1721_s24 = scalar_lea.hbm %s2045_s25, 4096  ;;  %s2051_s23 = int_to_ptr.vmem [resolvable:$true] %s326_s23 }
  0x5f   : > { %p1722_p9 = scmp.ne.s32.totalorder %s2045_s25, %s1721_s24  ;;  %p1723_p11 = pneg %p2047_p8 }
  0x60   : > { %s1726_s29 = scalar_lea.hbm %s2624_s5, 12288  ;;  %p1727_p0 = scmp.lt.u32.totalorder %s2045_s25, %s2624_s5 }
  0x61   : > { %p1724_p12 = pnand %p1723_p11, %p1722_p9  ;;  %p1728_p2 = scmp.lt.u32.totalorder %s1726_s29, %s1721_s24 }
  0x62   : > { %p1730_p7 = scmp.lt.u32.totalorder %s1721_s24, %s2045_s25 }
  0x63   : > { %p1725_p13 = pneg %p1724_p12  ;;  %p1729_p3 = por %p1728_p2, %p1727_p0 }
  0x65   : > { %p1731_p10 = por %p1730_p7, %p1729_p3 }
  0x67   : > { %p1732_p1 = pnand %p1731_p10, %p1725_p13 }
  0x69   : > { %1735 = shalt.err (!%p1732_p1)
}
  0x6a   : > { %s1736_s1 = scalar_lea.vmem %s2051_s23, 4096  ;;  %s1839_s30 = smov [#allocation11]  }
  0x6b   : > { %p1737_p4 = scmp.ne.s32.totalorder %s2051_s23, %s1736_s1  ;;  %s1741_s22 = sshll.u32 %s1839_s30, 4  ;;  %s1742_s22 = int_to_ptr.vmem [resolvable:$false] %s1741_s22 }
  0x6c   : > { %s1743_s18 = scalar_lea.vmem %s1742_s22, 8192  ;;  %p1744_p9 = scmp.lt.s32.totalorder %s2051_s23, %s1742_s22 }
  0x6d   : > { %p1739_p5 = pnand %p1737_p4, %p1723_p11  ;;  %p1745_p12 = scmp.lt.s32.totalorder %s1743_s18, %s1736_s1 }
  0x6f   : > { %p1740_p6 = pneg %p1739_p5  ;;  %p1746_p0 = por %p1745_p12, %p1744_p9 }
  0x71   : > { %p1747_p2 = pnand %p1746_p0, %p1740_p6 }
  0x73   : > { %1750 = shalt.err (!%p1747_p2)
}
  0x74   : > { %1570 = dma.hbm_to_vmem [thread:$0]  (!%p2047_p8), %s2045_s25, 4096, %s2051_s23, %s2053_s12, %s1834_s16, %s1834_s16, %s1835_s19  }
  0x75   : > { %p2639_p11 = scmp.ne.s32.totalorder %s2634_s15, 0 }
  0x76   : > { %p2640_p13 = scmp.eq.s32.totalorder (!%p2639_p11), %s1926_s13, 0 }
  0x77   : > { %338 = sbr.rel (%p2639_p11) target bundleno = 1001 (0x3e9), region = 56 }
  0x7e   : > { %1794 = dma.done.wait (%p2640_p13), [#allocation7], 16   ;;  %p2641_p3 = pmov %p2640_p13 }
  0x80   : > { %1796 = vsyncadd (%p2641_p3), [#allocation7], 4294967280  ;;  %p2642_p7 = pmov %p2641_p3 }
  0x81   : > { %p2643_p10 = pmov %p2641_p3 }
  0x82   : > { %1798 = dma.done.wait (%p2642_p7), [#allocation8], 16  }
  0x83   : > { %1800 = vsyncadd (%p2643_p10), [#allocation8], 4294967280  ;;  %p2644_p1 = pmov %p2641_p3 }
  0x85   : > { %1802 = dma.done.wait (%p2644_p1), [#allocation5], 384   ;;  %p2645_p8 = pmov %p2644_p1 }
  0x86   : > { %s352_s15 = sand.u32 1, %s1926_s13   ;;  %s354_s16 = sand.u32 1, %s1823_s10  }
  0x87   : > { %1804 = vsyncadd (%p2645_p8), [#allocation5], 4294966912  ;;  %s1347_s19 = sshll.u32 %s354_s16, 8  ;;  %s353_s25 = scalar_lea.sflag [#allocation12], %s352_s15 }
  0x88   : > { %s2100_s21 = scalar_lea.vmem [#allocation11], %s1347_s19  ;;  %p2646_p4 = scmp.ne.s32.totalorder %s2633_s14, 0 }
  0x8a   : > { %1806 = dma.done.wait (%p2646_p4), %s353_s25, 4096  }
  0x8b   : > { %1808 = vsyncadd (%p2646_p4), %s353_s25, 4294963200  ;;  %p2647_p5 = pmov %p2644_p1 }
  0x8c   : > { %p2648_p6 = pmov %p2644_p1 }
  0x8d   : > { %1810 = dma.done.wait (%p2647_p5), [#allocation12], 2048  }
  0x8e   : > { %1812 = vsyncadd (%p2648_p6), [#allocation12], 4294965248 }
  0x8f   : > { %365 = sfence }
  0x90   : > { %p2649_p9 = scmp.ne.s32.totalorder %s1926_s13, 0 }
  0x91   : > { %v402_v0 = vlaneseq (!%p2649_p9)  ;;  %v400_v2 = vld [vmem:[%s2623_s4] sm:$0x3] (!%p2649_p9)  ;;  %s1840_s14 = smov (!%p2649_p9), 2   ;;  %s1841_s29 = smov (!%p2649_p9), 16   ;;  %v2126_v10 = vld [vmem:[#allocation10] sm:$0xff] (!%p2649_p9)  ;;  %v2128_v11 = vld [vmem:[#allocation10 + $0x8] sm:$0xff] (!%p2649_p9) }
  0x92   : > { %395 = sbr.rel (%p2649_p9) target bundleno = 497 (0x1f1), region = 80  ;;  %v399_v3 = vld [vmem:[%s2622_s3] sm:$0x3] (!%p2649_p9)  ;;  %s1350_s17 = sld [smem:[#allocation4 + $0x1]] (!%p2649_p9)  ;;  %v2132_v16 = vld [vmem:[#allocation10 + $0x10] sm:$0xff] (!%p2649_p9)  ;;  %vm505_vm0 = vcmask (!%p2649_p9), 1039360  }
  0x93   : > { %v403_v1 = vshrl.u32 (!%p2649_p9), %v402_v0, 7  ;;  %s1842_s20 = smov (!%p2649_p9), 18   ;;  %s1353_s1 = sld [smem:[#allocation4 + $0x4]] (!%p2649_p9)  ;;  %vm568_vm1 = vcmask (!%p2649_p9), 908288   ;;  %vm631_vm2 = vcmask (!%p2649_p9), 777216   ;;  %vm427_vm3 = vcmask (!%p2649_p9), 15360  }
  0x94   : > { %s1843_s30 = smov (!%p2649_p9), 32   ;;  %s1844_s22 = smov (!%p2649_p9), 34   ;;  %vm463_vm4 = vcmask (!%p2649_p9), 261120   ;;  %vm439_vm5 = vcmask (!%p2649_p9), 130048   ;;  %vm475_vm6 = vcmask (!%p2649_p9), 277504   ;;  %vm451_vm7 = vcmask (!%p2649_p9), 146432  }
  0x95   : > { %v404_v4 = vsub.s32 (!%p2649_p9), 0, %v403_v1  ;;  %v408_v5 = vsub.s32 (!%p2649_p9), 1, %v403_v1  ;;  %s1356_s18 = sld [smem:[#allocation4 + $0x7]] (!%p2649_p9)  ;;  %s1845_s15 = smov (!%p2649_p9), 127   ;;  %vm526_vm8 = vcmask (!%p2649_p9), 1031168   ;;  %vm547_vm9 = vcmask (!%p2649_p9), 916480  }
  0x96   : > { %s1360_s16 = sld [smem:[#allocation4 + $0xa]] (!%p2649_p9)  ;;  %s1846_s19 = smov (!%p2649_p9), 111   ;;  %vm589_vm10 = vcmask (!%p2649_p9), 900096   ;;  %vm610_vm11 = vcmask (!%p2649_p9), 785408   ;;  %vm652_vm12 = vcmask (!%p2649_p9), 769024  }
  0x97   : > { %v418_v6 = vrot.slane (!%p2649_p9), %v400_v2, %v404_v4  ;;  %v2118_v7 = vrot.slane (!%p2649_p9), %v399_v3, %v404_v4  ;;  %v422_v8 = vrot.slane (!%p2649_p9), %v400_v2, %v408_v5  ;;  %v2121_v9 = vrot.slane (!%p2649_p9), %v399_v3, %v408_v5  ;;  %s1363_s25 = sld [smem:[#allocation4 + $0xd]] (!%p2649_p9)  ;;  %s1370_s23 = sld [smem:[#allocation4 + $0x13]] (!%p2649_p9) }
  0x98   : > { %v492_v12 = vstv (!%p2649_p9), %s1350_s17  ;;  %s1847_s12 = smov (!%p2649_p9), 95   ;;  %s1373_s24 = sld [smem:[#allocation4 + $0x16]] (!%p2649_p9) }
  0x99   : > { %423 = vrot.lane.b32.xlu0 %v418_v6, %s1840_s14  ;;  %435 = vrot.lane.b32.xlu1 %v2118_v7, %s1841_s29  ;;  %v494_v13 = vmul.f32 %v492_v12, %v2128_v11  ;;  %v493_v14 = vmul.f32 %v492_v12, %v2126_v10  ;;  %v555_v15 = vstv %s1353_s1  ;;  %v495_v18 = vmul.f32 %v492_v12, %v2132_v16  ;;  %s1352_s28 = sld [smem:[#allocation4 + $0x3]]  ;;  %s2194_s17 = sld [smem:[#allocation4]] }
  0x9a   : > { %v556_v17 = vmul.f32 %v555_v15, %v2126_v10  ;;  %v558_v19 = vmul.f32 %v555_v15, %v2132_v16  ;;  %v557_v20 = vmul.f32 %v555_v15, %v2128_v11  ;;  %s1848_s1 = smov 112   ;;  %v2233_v60 = vmul.f32 %v2118_v7, %v2126_v10 }
  0x9b   : > { %v618_v21 = vstv %s1356_s18  ;;  %s1362_s18 = sld [smem:[#allocation4 + $0xc]]  ;;  %v2258_v5 = vmul.f32 %v2121_v9, %v2128_v11 }
  0x9c   : > { %v620_v22 = vmul.f32 %v618_v21, %v2128_v11  ;;  %v619_v23 = vmul.f32 %v618_v21, %v2126_v10  ;;  %v672_v24 = vstv %s1360_s16  ;;  %v621_v26 = vmul.f32 %v618_v21, %v2132_v16  ;;  %s1850_s16 = smov 110  }
  0x9d   : > { %425 = vrot.lane.b32.xlu0 %v422_v8, %s1840_s14  ;;  %437 = vrot.lane.b32.xlu1 %v2121_v9, %s1841_s29  ;;  %v674_v25 = vmul.f32 %v672_v24, %v2128_v11  ;;  %v732_v27 = vstv %s1363_s25  ;;  %v673_v29 = vmul.f32 %v672_v24, %v2126_v10  ;;  %v845_v30 = vstv %s1370_s23  ;;  %s1351_s14 = sld [smem:[#allocation4 + $0x2]]  ;;  %s1354_s29 = sld [smem:[#allocation4 + $0x5]] }
  0x9e   : > { %v733_v28 = vmul.f32 %v732_v27, %v2126_v10  ;;  %v847_v31 = vmul.f32 %v845_v30, %v2128_v11  ;;  %v675_v32 = vmul.f32 %v672_v24, %v2132_v16  ;;  %v734_v33 = vmul.f32 %v732_v27, %v2128_v11  ;;  %s1851_s25 = smov 96   ;;  %s1361_s23 = sld [smem:[#allocation4 + $0xb]] }
  0x9f   : > { %v846_v34 = vmul.f32 %v845_v30, %v2126_v10  ;;  %v905_v35 = vstv %s1373_s24  ;;  %v848_v36 = vmul.f32 %v845_v30, %v2132_v16  ;;  %v735_v38 = vmul.f32 %v732_v27, %v2132_v16  ;;  %s2296_s24 = sld [smem:[#allocation4 + $0x9]] }
  0xa0   : > { %v906_v37 = vmul.f32 %v905_v35, %v2126_v10  ;;  %v908_v39 = vmul.f32 %v905_v35, %v2132_v16  ;;  %v907_v40 = vmul.f32 %v905_v35, %v2128_v11  ;;  %v2178_v43 = vstv %s1352_s28  ;;  %s1364_s28 = sld [smem:[#allocation4 + $0xe]] }
  0xa1   : > { %447 = vrot.lane.b32.xlu0 %v418_v6, %s1842_s20  ;;  %449 = vrot.lane.b32.xlu1 %v422_v8, %s1842_s20  ;;  %s1355_s20 = sld [smem:[#allocation4 + $0x6]]  ;;  %v486_v62 = vstv %s2194_s17  ;;  %s1371_s17 = sld [smem:[#allocation4 + $0x14]] }
  0xa3   : > { %v2180_v44 = vstv %s1351_s14  ;;  %v2220_v57 = vstv %s1354_s29  ;;  %s1852_s14 = smov 94   ;;  %s2309_s29 = sld [smem:[#allocation9 + $0x1]] }
  0xa5   : > { %459 = vrot.lane.b32.xlu0 %v2118_v7, %s1843_s30  ;;  %461 = vrot.lane.b32.xlu1 %v2121_v9, %s1843_s30  ;;  %s1849_s30 = smov 126  }
  0xa7   : > { %v2243_v1 = vstv %s1355_s20  ;;  %s2326_s20 = sld [smem:[#allocation4 + $0x12]] }
  0xa9   : > { %471 = vrot.lane.b32.xlu0 %v418_v6, %s1844_s22  ;;  %473 = vrot.lane.b32.xlu1 %v422_v8, %s1844_s22  ;;  %s2214_s22 = sld [smem:[#allocation9]]  ;;  %v487_v6 = vmul.f32 %v486_v62, %v2233_v60 }
  0xad   : > { %501 = vrot.lane.b32.xlu1 %v494_v13, %s1845_s15  ;;  %499 = vrot.lane.b32.xlu0 %v493_v14, %s1845_s15  ;;  %v2268_v14 = vstv %s1362_s18  ;;  %s2341_s18 = sld [smem:[#allocation9 + $0x2]] }
  0xaf   : > { %v484_v8 = vstv %s2214_s22  ;;  %s1365_s22 = sld [smem:[#allocation4 + $0xf]] }
  0xb1   : > { %562 = vrot.lane.b32.xlu1 %v556_v17, %s1846_s19  ;;  %503 = vrot.lane.b32.xlu0 %v495_v18, %s1845_s15  ;;  %v489_v18 = vadd.f32 %v487_v6, %v484_v8 }
  0xb5   : > { %566 = vrot.lane.b32.xlu1 %v558_v19, %s1846_s19  ;;  %564 = vrot.lane.b32.xlu0 %v557_v20, %s1846_s19  ;;  %v488_v19 = vmul.f32 %v486_v62, %v2258_v5 }
  0xb7   : > { %v490_v27 = vadd.f32 %v488_v19, %v484_v8  ;;  %v2343_v8 = vstv %s1371_s17 }
  0xb9   : > { %627 = vrot.lane.b32.xlu1 %v620_v22, %s1847_s12  ;;  %625 = vrot.lane.b32.xlu0 %v619_v23, %s1847_s12 }
  0xbd   : > { %681 = vrot.lane.b32.xlu1 %v674_v25, %s1845_s15  ;;  %629 = vrot.lane.b32.xlu0 %v621_v26, %s1847_s12 }
  0xc1   : > { %739 = vrot.lane.b32.xlu1 %v733_v28, %s1846_s19  ;;  %679 = vrot.lane.b32.xlu0 %v673_v29, %s1845_s15 }
  0xc5   : > { %854 = vrot.lane.b32.xlu1 %v847_v31, %s1845_s15  ;;  %683 = vrot.lane.b32.xlu0 %v675_v32, %s1845_s15 }
  0xc9   : > { %741 = vrot.lane.b32.xlu1 %v734_v33, %s1846_s19  ;;  %852 = vrot.lane.b32.xlu0 %v846_v34, %s1845_s15 }
  0xcd   : > { %856 = vrot.lane.b32.xlu0 %v848_v36, %s1845_s15  ;;  %912 = vrot.lane.b32.xlu1 %v906_v37, %s1846_s19  ;;  %s1357_s15 = sld [smem:[#allocation4 + $0x8]]  ;;  %v2311_v36 = vstv %s1361_s23 }
  0xce   : > { %s1366_s23 = sld [smem:[#allocation4 + $0x10]] }
  0xd1   : > { %743 = vrot.lane.b32.xlu0 %v735_v38, %s1846_s19  ;;  %916 = vrot.lane.b32.xlu1 %v908_v39, %s1846_s19 }
  0xd3   : > { %v2278_v17 = vstv %s1357_s15  ;;  %s1374_s15 = sld [smem:[#allocation4 + $0x17]] }
  0xd5   : > { %914 = vrot.lane.b32.xlu0 %v907_v40, %s1846_s19  ;;  %s1372_s19 = sld [smem:[#allocation4 + $0x15]] }
  0xdb   : > { %v2298_v29 = vstv %s1372_s19  ;;  %s1375_s19 = sld [smem:[#allocation4 + $0x18]] }
 0x10b   : > { %v2174_v41 = vpop.permute.xlu0 %423  ;;  %v2176_v42 = vpop.permute.xlu1 %435 }
 0x10c   : > { %v2184_v45 = vmul.f32 %v2174_v41, %v2126_v10  ;;  %v2188_v46 = vmul.f32 %v2176_v42, %v2126_v10 }
 0x10e   : > { %v535_v47 = vmul.f32 %v2178_v43, %v2188_v46  ;;  %v514_v48 = vmul.f32 %v2180_v44, %v2184_v45  ;;  %v713_v20 = vmul.f32 %v2268_v14, %v2188_v46  ;;  %v886_v35 = vmul.f32 %v2298_v29, %v2188_v46 }
 0x10f   : > { %v2196_v49 = vpop.permute.xlu0 %425  ;;  %v2198_v50 = vpop.permute.xlu1 %437 }
 0x110   : > { %v2202_v51 = vmul.f32 %v2196_v49, %v2132_v16  ;;  %v2206_v52 = vmul.f32 %v2198_v50, %v2132_v16  ;;  %541 = vrot.lane.b32.xlu0 %v535_v47, %s1848_s1  ;;  %520 = vrot.lane.b32.xlu1 %v514_v48, %s1849_s30  ;;  %v693_v47 = vmul.f32 %v2311_v36, %v2184_v45  ;;  %v666_v48 = vstv %s2296_s24 }
 0x112   : > { %v537_v53 = vmul.f32 %v2178_v43, %v2206_v52  ;;  %v516_v54 = vmul.f32 %v2180_v44, %v2202_v51  ;;  %v715_v28 = vmul.f32 %v2268_v14, %v2206_v52  ;;  %v888_v46 = vmul.f32 %v2298_v29, %v2206_v52 }
 0x113   : > { %v2216_v55 = vpop.permute.xlu0 %447  ;;  %v2218_v56 = vpop.permute.xlu1 %449  ;;  %v667_v52 = vmul.f32 %v666_v48, %v2233_v60  ;;  %v695_v6 = vmul.f32 %v2311_v36, %v2202_v51 }
 0x114   : > { %v2224_v58 = vmul.f32 %v2216_v55, %v2126_v10  ;;  %v2228_v59 = vmul.f32 %v2218_v56, %v2132_v16  ;;  %545 = vrot.lane.b32.xlu0 %v537_v53, %s1848_s1  ;;  %524 = vrot.lane.b32.xlu1 %v516_v54, %s1849_s30  ;;  %v2328_v53 = vstv %s1364_s28 }
 0x116   : > { %v577_v61 = vmul.f32 %v2220_v57, %v2224_v58  ;;  %v579_v4 = vmul.f32 %v2220_v57, %v2228_v59 }
 0x117   : > { %v2239_v63 = vpop.permute.xlu0 %459  ;;  %v2241_v0 = vpop.permute.xlu1 %461 }
 0x118   : > { %v2247_v2 = vmul.f32 %v2239_v63, %v2126_v10  ;;  %v2251_v3 = vmul.f32 %v2241_v0, %v2132_v16  ;;  %583 = vrot.lane.b32.xlu0 %v577_v61, %s1850_s16 }
 0x11a   : > { %v598_v7 = vmul.f32 %v2243_v1, %v2247_v2  ;;  %v600_v15 = vmul.f32 %v2243_v1, %v2251_v3 }
 0x11b   : > { %v2264_v12 = vpop.permute.xlu0 %471  ;;  %v2266_v13 = vpop.permute.xlu1 %473 }
 0x11c   : > { %587 = vrot.lane.b32.xlu0 %v579_v4, %s1850_s16  ;;  %604 = vrot.lane.b32.xlu1 %v598_v7, %s1851_s25  ;;  %v2274_v9 = vmul.f32 %v2264_v12, %v2126_v10  ;;  %v2285_v23 = vmul.f32 %v2266_v13, %v2132_v16  ;;  %v753_v4 = vmul.f32 %v2328_v53, %v2224_v58  ;;  %v664_v7 = vstv %s2309_s29 }
 0x11e   : > { %v640_v24 = vmul.f32 %v2278_v17, %v2274_v9  ;;  %v642_v32 = vmul.f32 %v2278_v17, %v2285_v23 }
 0x11f   : > { %v502_v21 = vpop.permute.xlu1 %501  ;;  %v500_v22 = vpop.permute.xlu0 %499 }
 0x120   : > { %719 = vrot.lane.b32.xlu0 %v713_v20, %s1848_s1  ;;  %608 = vrot.lane.b32.xlu1 %v600_v15, %s1851_s25  ;;  %v506_v25 = vsel %vm505_vm0, %v500_v22, %v502_v21  ;;  %v669_v20 = vadd.f32 %v667_v52, %v664_v7  ;;  %v755_v22 = vmul.f32 %v2328_v53, %v2228_v59 }
 0x121   : > { %v2292_v26 = vadd.f32 %v506_v25, %v489_v18  ;;  %v839_v25 = vstv %s2326_s20 }
 0x123   : > { %v563_v30 = vpop.permute.xlu1 %562  ;;  %v504_v31 = vpop.permute.xlu0 %503 }
 0x124   : > { %723 = vrot.lane.b32.xlu0 %v715_v28, %s1848_s1  ;;  %646 = vrot.lane.b32.xlu1 %v640_v24, %s1852_s14  ;;  %v507_v33 = vsel %vm505_vm0, %v502_v21, %v504_v31  ;;  %v668_v21 = vmul.f32 %v666_v48, %v2258_v5  ;;  %v866_v24 = vmul.f32 %v2343_v8, %v2184_v45  ;;  %v2358_v28 = vstv %s1365_s22 }
 0x125   : > { %v2305_v34 = vadd.f32 %v507_v33, %v490_v27  ;;  %v428_v27 = vsel %vm427_vm3, %v2174_v41, %v2196_v49  ;;  %v840_v45 = vmul.f32 %v839_v25, %v2233_v60  ;;  %v773_v41 = vmul.f32 %v2358_v28, %v2247_v2 }
 0x126   : > { %v868_v49 = vmul.f32 %v2343_v8, %v2202_v51  ;;  %v841_v51 = vmul.f32 %v839_v25, %v2258_v5 }
 0x127   : > { %v567_v37 = vpop.permute.xlu1 %566  ;;  %v565_v38 = vpop.permute.xlu0 %564 }
 0x128   : > { %892 = vrot.lane.b32.xlu0 %v886_v35, %s1848_s1  ;;  %650 = vrot.lane.b32.xlu1 %v642_v32, %s1852_s14  ;;  %v2316_v39 = vsel %vm568_vm1, %v563_v30, %v565_v38  ;;  %v2319_v40 = vsel %vm568_vm1, %v565_v38, %v567_v37  ;;  %v670_v35 = vadd.f32 %v668_v21, %v664_v7  ;;  %v837_v38 = vstv %s2341_s18 }
 0x129   : > { %v433_v37 = vmul.f32 %v428_v27, %v2128_v11  ;;  %v842_v52 = vadd.f32 %v840_v45, %v837_v38  ;;  %v476_v7 = vsel %vm475_vm6, %v2264_v12, %v2266_v13  ;;  %v452_v21 = vsel %vm451_vm7, %v2216_v55, %v2218_v56 }
 0x12b   : > { %v628_v54 = vpop.permute.xlu1 %627  ;;  %v626_v61 = vpop.permute.xlu0 %625  ;;  %v694_v56 = vmul.f32 %v2311_v36, %v433_v37 }
 0x12c   : > { %896 = vrot.lane.b32.xlu0 %v888_v46, %s1848_s1  ;;  %699 = vrot.lane.b32.xlu1 %v693_v47, %s1849_s30  ;;  %v2333_v62 = vsel %vm631_vm2, %v626_v61, %v628_v54  ;;  %v464_v46 = vsel %vm463_vm4, %v2239_v63, %v2241_v0  ;;  %v925_v47 = vstv %s1374_s15  ;;  %v515_v63 = vmul.f32 %v2180_v44, %v433_v37 }
 0x12d   : > { %v926_v0 = vmul.f32 %v925_v47, %v2224_v58  ;;  %v843_v58 = vadd.f32 %v841_v51, %v837_v38  ;;  %v928_v13 = vmul.f32 %v925_v47, %v2228_v59  ;;  %v775_v38 = vmul.f32 %v2358_v28, %v2251_v3 }
 0x12f   : > { %v682_v15 = vpop.permute.xlu1 %681  ;;  %v630_v18 = vpop.permute.xlu0 %629 }
 0x130   : > { %759 = vrot.lane.b32.xlu0 %v753_v4, %s1850_s16  ;;  %703 = vrot.lane.b32.xlu1 %v695_v6, %s1849_s30  ;;  %v2348_v19 = vsel %vm631_vm2, %v628_v54, %v630_v18  ;;  %v469_v4 = vmul.f32 %v464_v46, %v2128_v11  ;;  %v440_v6 = vsel %vm439_vm5, %v2176_v42, %v2198_v50 }
 0x131   : > { %v445_v42 = vmul.f32 %v440_v6, %v2128_v11  ;;  %v2397_v50 = vmul.f32 %v476_v7, %v2128_v11 }
 0x132   : > { %v599_v12 = vmul.f32 %v2243_v1, %v469_v4 }
 0x133   : > { %v740_v30 = vpop.permute.xlu1 %739  ;;  %v680_v31 = vpop.permute.xlu0 %679  ;;  %v641_v1 = vmul.f32 %v2278_v17, %v2397_v50  ;;  %v536_v59 = vmul.f32 %v2178_v43, %v445_v42  ;;  %v887_v36 = vmul.f32 %v2298_v29, %v445_v42 }
 0x134   : > { %763 = vrot.lane.b32.xlu0 %v755_v22, %s1850_s16  ;;  %872 = vrot.lane.b32.xlu1 %v866_v24, %s1849_s30  ;;  %v685_v32 = vsel %vm505_vm0, %v680_v31, %v682_v15 }
 0x135   : > { %v2363_v33 = vadd.f32 %v685_v32, %v669_v20 }
 0x137   : > { %v855_v48 = vpop.permute.xlu1 %854  ;;  %v684_v54 = vpop.permute.xlu0 %683 }
 0x138   : > { %779 = vrot.lane.b32.xlu0 %v773_v41, %s1851_s25  ;;  %876 = vrot.lane.b32.xlu1 %v868_v49, %s1849_s30  ;;  %v686_v60 = vsel %vm505_vm0, %v682_v15, %v684_v54  ;;  %v867_v41 = vmul.f32 %v2343_v8, %v433_v37  ;;  %v714_v49 = vmul.f32 %v2268_v14, %v445_v42  ;;  %v945_v37 = vstv %s1375_s19 }
 0x139   : > { %v2377_v61 = vadd.f32 %v686_v60, %v670_v35  ;;  %v792_v14 = vstv %s1366_s23  ;;  %v947_v46 = vmul.f32 %v945_v37, %v469_v4  ;;  %v948_v60 = vmul.f32 %v945_v37, %v2251_v3 }
 0x13a   : > { %v793_v29 = vmul.f32 %v792_v14, %v2126_v10 }
 0x13b   : > { %v742_v18 = vpop.permute.xlu1 %741  ;;  %v853_v20 = vpop.permute.xlu0 %852 }
 0x13c   : > { %522 = vrot.lane.b32.xlu0 %v515_v63, %s1849_s30  ;;  %932 = vrot.lane.b32.xlu1 %v926_v0, %s1850_s16  ;;  %v2390_v5 = vsel %vm568_vm1, %v740_v30, %v742_v18  ;;  %v858_v44 = vsel %vm505_vm0, %v853_v20, %v855_v48  ;;  %v457_v30 = vmul.f32 %v452_v21, %v2128_v11 }
 0x13d   : > { %v2393_v15 = vadd.f32 %v858_v44, %v842_v52  ;;  %v794_v52 = vmul.f32 %v792_v14, %v2128_v11 }
 0x13e   : > { %v578_v32 = vmul.f32 %v2220_v57, %v457_v30  ;;  %v927_v57 = vmul.f32 %v925_v47, %v457_v30  ;;  %v754_v8 = vmul.f32 %v2328_v53, %v457_v30  ;;  %v774_v47 = vmul.f32 %v2358_v28, %v469_v4 }
 0x13f   : > { %v857_v22 = vpop.permute.xlu0 %856  ;;  %v913_v27 = vpop.permute.xlu1 %912  ;;  %v795_v53 = vmul.f32 %v792_v14, %v2132_v16 }
 0x140   : > { %606 = vrot.lane.b32.xlu0 %v599_v12, %s1851_s25  ;;  %936 = vrot.lane.b32.xlu1 %v928_v13, %s1850_s16  ;;  %v859_v24 = vsel %vm505_vm0, %v855_v48, %v857_v22  ;;  %v946_v48 = vmul.f32 %v945_v37, %v2247_v2 }
 0x141   : > { %v2406_v25 = vadd.f32 %v859_v24, %v843_v58 }
 0x143   : > { %v744_v31 = vpop.permute.xlu0 %743  ;;  %v917_v35 = vpop.permute.xlu1 %916 }
 0x144   : > { %648 = vrot.lane.b32.xlu0 %v641_v1, %s1852_s14  ;;  %543 = vrot.lane.b32.xlu1 %v536_v59, %s1848_s1  ;;  %v2415_v55 = vsel %vm568_vm1, %v742_v18, %v744_v31 }
 0x147   : > { %v915_v45 = vpop.permute.xlu0 %914 }
 0x148   : > { %701 = vrot.lane.b32.xlu0 %v694_v56, %s1849_s30  ;;  %585 = vrot.lane.b32.xlu1 %v578_v32, %s1850_s16  ;;  %v2422_v43 = vsel %vm568_vm1, %v913_v27, %v915_v45  ;;  %v2425_v17 = vsel %vm568_vm1, %v915_v45, %v917_v35 }
 0x14c   : > { %874 = vrot.lane.b32.xlu0 %v867_v41, %s1849_s30  ;;  %721 = vrot.lane.b32.xlu1 %v714_v49, %s1848_s1  ;;  %s1376_s30 = sld [smem:[#allocation4 + $0x19]] }
 0x150   : > { %934 = vrot.lane.b32.xlu0 %v927_v57, %s1850_s16  ;;  %894 = vrot.lane.b32.xlu1 %v887_v36, %s1848_s1  ;;  %s1367_s1 = sld [smem:[#allocation4 + $0x11]] }
 0x152   : > { %v965_v54 = vstv %s1376_s30 }
 0x153   : > { %v967_v28 = vmul.f32 %v965_v54, %v2128_v11  ;;  %v966_v2 = vmul.f32 %v965_v54, %v2126_v10  ;;  %v968_v3 = vmul.f32 %v965_v54, %v2132_v16  ;;  %v1378_v10 = vld [vmem:[%s2625_s6] ss:$0 sm:$0xff] }
 0x154   : > { %783 = vrot.lane.b32.xlu0 %v775_v38, %s1851_s25  ;;  %761 = vrot.lane.b32.xlu1 %v754_v8, %s1850_s16  ;;  %s1377_s16 = sld [smem:[#allocation4 + $0x1a]]  ;;  %1017 = vst [vmem:[#allocation3] sm:$0xff] %v1378_v10 }
 0x156   : > { %v812_v51 = vstv %s1367_s1 }
 0x157   : > { %v813_v4 = vmul.f32 %v812_v51, %v2274_v9  ;;  %v815_v63 = vmul.f32 %v812_v51, %v2285_v23  ;;  %v814_v6 = vmul.f32 %v812_v51, %v2397_v50 }
 0x158   : > { %954 = vrot.lane.b32.xlu0 %v947_v46, %s1851_s25  ;;  %781 = vrot.lane.b32.xlu1 %v774_v47, %s1851_s25 }
 0x15a   : > { %v985_v0 = vstv %s1377_s16 }
 0x15b   : > { %v987_v11 = vmul.f32 %v985_v0, %v2397_v50  ;;  %v986_v16 = vmul.f32 %v985_v0, %v2274_v9  ;;  %v988_v7 = vmul.f32 %v985_v0, %v2285_v23 }
 0x15c   : > { %799 = vrot.lane.b32.xlu0 %v793_v29, %s1847_s12  ;;  %952 = vrot.lane.b32.xlu1 %v946_v48, %s1851_s25 }
 0x160   : > { %803 = vrot.lane.b32.xlu0 %v795_v53, %s1847_s12  ;;  %956 = vrot.lane.b32.xlu1 %v948_v60, %s1851_s25 }
 0x164   : > { %974 = vrot.lane.b32.xlu0 %v967_v28, %s1847_s12  ;;  %801 = vrot.lane.b32.xlu1 %v794_v52, %s1847_s12 }
 0x168   : > { %819 = vrot.lane.b32.xlu0 %v813_v4, %s1852_s14  ;;  %972 = vrot.lane.b32.xlu1 %v966_v2, %s1847_s12 }
 0x16c   : > { %823 = vrot.lane.b32.xlu0 %v815_v63, %s1852_s14  ;;  %976 = vrot.lane.b32.xlu1 %v968_v3, %s1847_s12 }
 0x170   : > { %994 = vrot.lane.b32.xlu0 %v987_v11, %s1852_s14  ;;  %821 = vrot.lane.b32.xlu1 %v814_v6, %s1852_s14 }
 0x174   : > { %992 = vrot.lane.b32.xlu1 %v986_v16, %s1852_s14 }
 0x178   : > { %996 = vrot.lane.b32.xlu1 %v988_v7, %s1852_s14 }
 0x182   : > { %v542_v18 = vpop.permute.xlu0 %541  ;;  %v521_v20 = vpop.permute.xlu1 %520 }
 0x186   : > { %v546_v44 = vpop.permute.xlu0 %545  ;;  %v525_v58 = vpop.permute.xlu1 %524 }
 0x18a   : > { %v584_v42 = vpop.permute.xlu0 %583 }
 0x18e   : > { %v588_v50 = vpop.permute.xlu0 %587  ;;  %v605_v12 = vpop.permute.xlu1 %604 }
 0x192   : > { %v720_v13 = vpop.permute.xlu0 %719  ;;  %v609_v21 = vpop.permute.xlu1 %608 }
 0x196   : > { %v724_v22 = vpop.permute.xlu0 %723  ;;  %v647_v24 = vpop.permute.xlu1 %646 }
 0x19a   : > { %v2473_v27 = vpop.permute.xlu0 %892  ;;  %v651_v9 = vpop.permute.xlu1 %650 }
 0x19e   : > { %v2475_v30 = vpop.permute.xlu0 %896  ;;  %v700_v1 = vpop.permute.xlu1 %699 }
 0x1a2   : > { %v2477_v23 = vpop.permute.xlu0 %759  ;;  %v704_v59 = vpop.permute.xlu1 %703 }
 0x1a6   : > { %v2479_v31 = vpop.permute.xlu0 %763  ;;  %v873_v56 = vpop.permute.xlu1 %872 }
 0x1aa   : > { %v2481_v32 = vpop.permute.xlu0 %779  ;;  %v877_v35 = vpop.permute.xlu1 %876 }
 0x1ae   : > { %v523_v45 = vpop.permute.xlu0 %522  ;;  %v2483_v41 = vpop.permute.xlu1 %932 }
 0x1af   : > { %v527_v36 = vsel %vm526_vm8, %v521_v20, %v523_v45  ;;  %v528_v38 = vsel %vm526_vm8, %v523_v45, %v525_v58 }
 0x1b0   : > { %v531_v8 = vadd.f32 %v527_v36, %v2292_v26  ;;  %v532_v37 = vadd.f32 %v528_v38, %v2305_v34 }
 0x1b2   : > { %v607_v49 = vpop.permute.xlu0 %606  ;;  %v2485_v57 = vpop.permute.xlu1 %936 }
 0x1b3   : > { %v611_v63 = vsel %vm610_vm11, %v605_v12, %v607_v49  ;;  %v612_v0 = vsel %vm610_vm11, %v607_v49, %v609_v21 }
 0x1b6   : > { %v649_v14 = vpop.permute.xlu0 %648  ;;  %v544_v46 = vpop.permute.xlu1 %543 }
 0x1b7   : > { %v548_v47 = vsel %vm547_vm9, %v542_v18, %v544_v46  ;;  %v549_v29 = vsel %vm547_vm9, %v544_v46, %v546_v44 }
 0x1b8   : > { %v552_v48 = vadd.f32 %v548_v47, %v531_v8  ;;  %v553_v53 = vadd.f32 %v549_v29, %v532_v37 }
 0x1ba   : > { %v702_v54 = vpop.permute.xlu0 %701  ;;  %v574_v60 = vadd.f32 %v2319_v40, %v553_v53  ;;  %v586_v28 = vpop.permute.xlu1 %585  ;;  %v573_v52 = vadd.f32 %v2316_v39, %v552_v48 }
 0x1bb   : > { %v705_v26 = vsel %vm526_vm8, %v700_v1, %v702_v54  ;;  %v706_v34 = vsel %vm526_vm8, %v702_v54, %v704_v59  ;;  %v590_v51 = vsel %vm589_vm10, %v584_v42, %v586_v28  ;;  %v591_v2 = vsel %vm589_vm10, %v586_v28, %v588_v50 }
 0x1bc   : > { %v594_v4 = vadd.f32 %v590_v51, %v573_v52  ;;  %v595_v3 = vadd.f32 %v591_v2, %v574_v60  ;;  %v709_v40 = vadd.f32 %v705_v26, %v2363_v33  ;;  %v710_v11 = vadd.f32 %v706_v34, %v2377_v61 }
 0x1bd   : > { %v653_v33 = vsel %vm652_vm12, %v647_v24, %v649_v14  ;;  %v654_v61 = vsel %vm652_vm12, %v649_v14, %v651_v9 }
 0x1be   : > { %v615_v39 = vadd.f32 %v611_v63, %v594_v4  ;;  %v616_v6 = vadd.f32 %v612_v0, %v595_v3  ;;  %v875_v10 = vpop.permute.xlu0 %874  ;;  %v722_v16 = vpop.permute.xlu1 %721 }
 0x1bf   : > { %v878_v7 = vsel %vm526_vm8, %v873_v56, %v875_v10  ;;  %v879_v18 = vsel %vm526_vm8, %v875_v10, %v877_v35  ;;  %v725_v20 = vsel %vm547_vm9, %v720_v13, %v722_v16  ;;  %v726_v44 = vsel %vm547_vm9, %v722_v16, %v724_v22 }
 0x1c0   : > { %v636_v58 = vadd.f32 %v2333_v62, %v615_v39  ;;  %v637_v42 = vadd.f32 %v2348_v19, %v616_v6  ;;  %v729_v50 = vadd.f32 %v725_v20, %v709_v40  ;;  %v730_v12 = vadd.f32 %v726_v44, %v710_v11 }
 0x1c1   : > { %v882_v59 = vadd.f32 %v878_v7, %v2393_v15  ;;  %v883_v56 = vadd.f32 %v879_v18, %v2406_v25 }
 0x1c2   : > { %v657_v21 = vadd.f32 %v653_v33, %v636_v58  ;;  %v658_v1 = vadd.f32 %v654_v61, %v637_v42  ;;  %v935_v35 = vpop.permute.xlu0 %934  ;;  %v895_v13 = vpop.permute.xlu1 %894  ;;  %v750_v49 = vadd.f32 %v2415_v55, %v730_v12  ;;  %v749_v36 = vadd.f32 %v2390_v5, %v729_v50 }
 0x1c3   : > { %v898_v22 = vsel %vm547_vm9, %v2473_v27, %v895_v13  ;;  %v899_v62 = vsel %vm547_vm9, %v895_v13, %v2475_v30  ;;  %v939_v7 = vsel %vm589_vm10, %v935_v35, %v2485_v57 }
 0x1c4   : > { %v659_v19 = vmax.f32 %v657_v21, 0.0  ;;  %v660_v24 = vmax.f32 %v658_v1, 0.0  ;;  %v902_v45 = vadd.f32 %v898_v22, %v882_v59  ;;  %v903_v9 = vadd.f32 %v899_v62, %v883_v56 }
 0x1c6   : > { %661 = vst [vmem:[#allocation2] sm:$0xff] %v659_v19  ;;  %662 = vst [vmem:[#allocation2 + $0x8] sm:$0xff] %v660_v24  ;;  %v922_v15 = vadd.f32 %v2422_v43, %v902_v45  ;;  %v923_v25 = vadd.f32 %v2425_v17, %v903_v9  ;;  %v784_v38 = vpop.permute.xlu0 %783  ;;  %v762_v8 = vpop.permute.xlu1 %761 }
 0x1c7   : > { %v765_v5 = vsel %vm589_vm10, %v2477_v23, %v762_v8  ;;  %v766_v43 = vsel %vm589_vm10, %v762_v8, %v2479_v31  ;;  %v938_v23 = vsel %vm589_vm10, %v2483_v41, %v935_v35 }
 0x1c8   : > { %v769_v60 = vadd.f32 %v765_v5, %v749_v36  ;;  %v770_v28 = vadd.f32 %v766_v43, %v750_v49  ;;  %v942_v3 = vadd.f32 %v938_v23, %v922_v15  ;;  %v943_v18 = vadd.f32 %v939_v7, %v923_v25 }
 0x1ca   : > { %v955_v27 = vpop.permute.xlu0 %954  ;;  %v782_v37 = vpop.permute.xlu1 %781 }
 0x1cb   : > { %v785_v17 = vsel %vm610_vm11, %v2481_v32, %v782_v37  ;;  %v786_v54 = vsel %vm610_vm11, %v782_v37, %v784_v38 }
 0x1cc   : > { %v789_v51 = vadd.f32 %v785_v17, %v769_v60  ;;  %v790_v2 = vadd.f32 %v786_v54, %v770_v28 }
 0x1ce   : > { %v800_v14 = vpop.permute.xlu0 %799  ;;  %v953_v30 = vpop.permute.xlu1 %952 }
 0x1cf   : > { %v958_v31 = vsel %vm610_vm11, %v953_v30, %v955_v27 }
 0x1d0   : > { %v962_v6 = vadd.f32 %v958_v31, %v942_v3 }
 0x1d2   : > { %v804_v46 = vpop.permute.xlu0 %803  ;;  %v957_v47 = vpop.permute.xlu1 %956 }
 0x1d3   : > { %v959_v41 = vsel %vm610_vm11, %v955_v27, %v957_v47 }
 0x1d4   : > { %v963_v12 = vadd.f32 %v959_v41, %v943_v18 }
 0x1d6   : > { %v975_v29 = vpop.permute.xlu0 %974  ;;  %v802_v48 = vpop.permute.xlu1 %801 }
 0x1d7   : > { %v805_v26 = vsel %vm631_vm2, %v800_v14, %v802_v48  ;;  %v806_v34 = vsel %vm631_vm2, %v802_v48, %v804_v46 }
 0x1d8   : > { %v809_v63 = vadd.f32 %v805_v26, %v789_v51  ;;  %v810_v32 = vadd.f32 %v806_v34, %v790_v2 }
 0x1da   : > { %v820_v53 = vpop.permute.xlu0 %819  ;;  %v973_v55 = vpop.permute.xlu1 %972 }
 0x1db   : > { %v978_v40 = vsel %vm631_vm2, %v973_v55, %v975_v29 }
 0x1dc   : > { %v982_v20 = vadd.f32 %v978_v40, %v962_v6 }
 0x1de   : > { %v977_v52 = vpop.permute.xlu1 %976  ;;  %v824_v4 = vpop.permute.xlu0 %823 }
 0x1df   : > { %v979_v61 = vsel %vm631_vm2, %v975_v29, %v977_v52 }
 0x1e0   : > { %v983_v1 = vadd.f32 %v979_v61, %v963_v12 }
 0x1e2   : > { %v822_v0 = vpop.permute.xlu1 %821  ;;  %v995_v44 = vpop.permute.xlu0 %994 }
 0x1e3   : > { %v825_v11 = vsel %vm652_vm12, %v820_v53, %v822_v0  ;;  %v826_v39 = vsel %vm652_vm12, %v822_v0, %v824_v4 }
 0x1e4   : > { %v829_v10 = vadd.f32 %v825_v11, %v809_v63  ;;  %v830_v16 = vadd.f32 %v826_v39, %v810_v32 }
 0x1e6   : > { %v831_v58 = vmax.f32 %v829_v10, 0.0  ;;  %v832_v42 = vmax.f32 %v830_v16, 0.0  ;;  %v993_v33 = vpop.permute.xlu1 %992 }
 0x1e7   : > { %v998_v50 = vsel %vm652_vm12, %v993_v33, %v995_v44 }
 0x1e8   : > { %834 = vst [vmem:[#allocation2 + $0x10] sm:$0xff] %v831_v58  ;;  %835 = vst [vmem:[#allocation2 + $0x18] sm:$0xff] %v832_v42  ;;  %v1002_v21 = vadd.f32 %v998_v50, %v982_v20 }
 0x1ea   : > { %v1004_v59 = vmax.f32 %v1002_v21, 0.0  ;;  %v997_v56 = vpop.permute.xlu1 %996 }
 0x1eb   : > { %v999_v57 = vsel %vm652_vm12, %v995_v44, %v997_v56 }
 0x1ec   : > { %1007 = vst [vmem:[#allocation2 + $0x20] sm:$0xff] %v1004_v59  ;;  %v1003_v35 = vadd.f32 %v999_v57, %v983_v1 }
 0x1ee   : > { %v1005_v13 = vmax.f32 %v1003_v35, 0.0 }
 0x1f0   : > { %1008 = vst [vmem:[#allocation2 + $0x28] sm:$0xff] %v1005_v13 }
 0x1f1 PF: > { %v1040_v22 = vld [vmem:[%s2100_s21 + $0x80] sm:$0xff]  ;;  %v1041_v62 = vld [vmem:[%s2100_s21 + $0x88] sm:$0xff]  ;;  %v1042_v9 = vld [vmem:[%s2100_s21 + $0x90] sm:$0xff]  ;;  %s1388_s12 = sshll.u32 %s1926_s13, 4  ;;  %p1381_p12 = scmp.ne.s32.totalorder %s1926_s13, 2 }
 0x1f2   : > { %v1024_v19 = vld [vmem:[%s2100_s21] sm:$0xff]  ;;  %v1476_v24 = vpack.c.bf16 %v1041_v62, %v1040_v22  ;;  %v1025_v45 = vld [vmem:[%s2100_s21 + $0x8] sm:$0xff]  ;;  %v1043_v49 = vld [vmem:[%s2100_s21 + $0x98] sm:$0xff]  ;;  %s2561_s28 = scalar_lea.vmem [#allocation2], %s1388_s12  ;;  %v1853_v1 = vmov (!%p1381_p12), 0.0|0.0   ;;  %vm1854_vm13 = vmmov (!%p1381_p12), 0  }
 0x1f3   : > { %v1478_v36 = vpack.c.bf16 %v1025_v45, %v1024_v19  ;;  %v1480_v15 = vpack.c.bf16 %v1043_v49, %v1042_v9  ;;  %v1026_v25 = vld [vmem:[%s2100_s21 + $0x10] sm:$0xff]  ;;  %v1027_v38 = vld [vmem:[%s2100_s21 + $0x18] sm:$0xff]  ;;  %v1044_v8 = vld [vmem:[%s2100_s21 + $0xa0] sm:$0xff]  ;;  %v1855_v57 = vmov (!%p1381_p12), 0.0  }
 0x1f4   : > { %1477 = vmatprep.subr.bf16.mxu0 %v1476_v24  ;;  %v1045_v27 = vld [vmem:[%s2100_s21 + $0xa8] sm:$0xff]  ;;  %v1482_v37 = vpack.c.bf16 %v1027_v38, %v1026_v25  ;;  %v1028_v30 = vld [vmem:[%s2100_s21 + $0x20] sm:$0xff]  ;;  %v1046_v47 = vld [vmem:[%s2100_s21 + $0xb0] sm:$0xff] }
 0x1f5   : > { %1479 = vmatpush3.bf16.msra.mxu0 %v1478_v36  ;;  %v1484_v14 = vpack.c.bf16 %v1045_v27, %v1044_v8  ;;  %v1029_v46 = vld [vmem:[%s2100_s21 + $0x28] sm:$0xff]  ;;  %v1047_v29 = vld [vmem:[%s2100_s21 + $0xb8] sm:$0xff]  ;;  %v1030_v55 = vld [vmem:[%s2100_s21 + $0x30] sm:$0xff] }
 0x1f6   : > { %1481 = vmatprep.subr.bf16.mxu0 %v1480_v15  ;;  %v1486_v48 = vpack.c.bf16 %v1029_v46, %v1028_v30  ;;  %v1488_v53 = vpack.c.bf16 %v1047_v29, %v1046_v47  ;;  %v1031_v5 = vld [vmem:[%s2100_s21 + $0x38] sm:$0xff]  ;;  %v1048_v43 = vld [vmem:[%s2100_s21 + $0xc0] sm:$0xff]  ;;  %v1049_v17 = vld [vmem:[%s2100_s21 + $0xc8] sm:$0xff] }
 0x1f7   : > { %v1023_v54 = vld [vmem:[%s2561_s28 + $0x8] sm:$0xff]  ;;  %v1490_v60 = vpack.c.bf16 %v1031_v5, %v1030_v55  ;;  %v1492_v28 = vpack.c.bf16 %v1049_v17, %v1048_v43  ;;  %v1032_v52 = vld [vmem:[%s2100_s21 + $0x40] sm:$0xff]  ;;  %v1050_v34 = vld [vmem:[%s2100_s21 + $0xd0] sm:$0xff] }
 0x1f8   : > { %1120 = vmatprep.mubr.f32.mxu0 %v1023_v54  ;;  %v1033_v26 = vld [vmem:[%s2100_s21 + $0x48] sm:$0xff]  ;;  %v1051_v51 = vld [vmem:[%s2100_s21 + $0xd8] sm:$0xff]  ;;  %v1034_v23 = vld [vmem:[%s2100_s21 + $0x50] sm:$0xff] }
 0x1f9   : > { %1483 = vmatpush3.bf16.msra.mxu0 %v1482_v37  ;;  %v1494_v2 = vpack.c.bf16 %v1033_v26, %v1032_v52  ;;  %v1496_v4 = vpack.c.bf16 %v1051_v51, %v1050_v34  ;;  %v1035_v31 = vld [vmem:[%s2100_s21 + $0x58] sm:$0xff]  ;;  %v1052_v3 = vld [vmem:[%s2100_s21 + $0xe0] sm:$0xff]  ;;  %v1053_v63 = vld [vmem:[%s2100_s21 + $0xe8] sm:$0xff] }
 0x1fa   : > { %1485 = vmatprep.subr.bf16.mxu0 %v1484_v14  ;;  %v1498_v32 = vpack.c.bf16 %v1035_v31, %v1034_v23  ;;  %v1500_v0 = vpack.c.bf16 %v1053_v63, %v1052_v3  ;;  %v1036_v40 = vld [vmem:[%s2100_s21 + $0x60] sm:$0xff]  ;;  %v1037_v11 = vld [vmem:[%s2100_s21 + $0x68] sm:$0xff]  ;;  %v1054_v39 = vld [vmem:[%s2100_s21 + $0xf0] sm:$0xff] }
 0x1fb   : > { %v1055_v6 = vld [vmem:[%s2100_s21 + $0xf8] sm:$0xff]  ;;  %v1502_v10 = vpack.c.bf16 %v1037_v11, %v1036_v40  ;;  %v1038_v7 = vld [vmem:[%s2100_s21 + $0x70] sm:$0xff]  ;;  %v1022_v20 = vld [vmem:[%s2561_s28] sm:$0xff] }
 0x1fc   : > { %v1504_v16 = vpack.c.bf16 %v1055_v6, %v1054_v39  ;;  %v1039_v41 = vld [vmem:[%s2100_s21 + $0x78] sm:$0xff]  ;;  %v1018_v58 = vld [vmem:[#allocation3] sm:$0xff]  ;;  %v1135_v12 = vld [vmem:[#allocation13 + $0x8] sm:$0xff] (!%p1381_p12) }
 0x1fd   : > { %1487 = vmatpush3.bf16.msra.mxu0 %v1486_v48  ;;  %v1506_v18 = vpack.c.bf16 %v1039_v41, %v1038_v7  ;;  %v1134_v50 = vld [vmem:[#allocation13] sm:$0xff] (!%p1381_p12)  ;;  %v1136_v21 = vld [vmem:[#allocation13 + $0x10] sm:$0xff] (!%p1381_p12)  ;;  %v1137_v56 = vld [vmem:[#allocation13 + $0x18] sm:$0xff] (!%p1381_p12) }
 0x1fe   : > { %1489 = vmatprep.subr.bf16.mxu0 %v1488_v53  ;;  %v1509_v59 = vpack.c.bf16 (!%p1381_p12), %v1135_v12, %v1134_v50  ;;  %v1512_v35 = vpack.c.bf16 (!%p1381_p12), %v1137_v56, %v1136_v21  ;;  %v1138_v13 = vld [vmem:[#allocation13 + $0x20] sm:$0xff] (!%p1381_p12)  ;;  %v1139_v22 = vld [vmem:[#allocation13 + $0x28] sm:$0xff] (!%p1381_p12)  ;;  %v1140_v19 = vld [vmem:[#allocation13 + $0x30] sm:$0xff] (!%p1381_p12) }
 0x1ff   : > { %v1515_v62 = vpack.c.bf16 (!%p1381_p12), %v1139_v22, %v1138_v13  ;;  %v1141_v24 = vld [vmem:[#allocation13 + $0x38] sm:$0xff] (!%p1381_p12)  ;;  %v1142_v9 = vld [vmem:[#allocation13 + $0x40] sm:$0xff] (!%p1381_p12)  ;;  %v1143_v49 = vld [vmem:[#allocation13 + $0x48] sm:$0xff] (!%p1381_p12) }
 0x200   : > { %v1518_v45 = vpack.c.bf16 (!%p1381_p12), %v1141_v24, %v1140_v19  ;;  %v1521_v36 = vpack.c.bf16 (!%p1381_p12), %v1143_v49, %v1142_v9  ;;  %v1144_v15 = vld [vmem:[#allocation13 + $0x50] sm:$0xff] (!%p1381_p12)  ;;  %v1145_v25 = vld [vmem:[#allocation13 + $0x58] sm:$0xff] (!%p1381_p12)  ;;  %v1146_v8 = vld [vmem:[#allocation13 + $0x60] sm:$0xff] (!%p1381_p12) }
 0x201   : > { %1491 = vmatpush3.bf16.msra.mxu0 %v1490_v60  ;;  %v1524_v38 = vpack.c.bf16 (!%p1381_p12), %v1145_v25, %v1144_v15  ;;  %v1147_v27 = vld [vmem:[#allocation13 + $0x68] sm:$0xff] (!%p1381_p12)  ;;  %v1148_v14 = vld [vmem:[#allocation13 + $0x70] sm:$0xff] (!%p1381_p12)  ;;  %v1149_v30 = vld [vmem:[#allocation13 + $0x78] sm:$0xff] (!%p1381_p12) }
 0x202   : > { %1493 = vmatprep.subr.bf16.mxu0 %v1492_v28  ;;  %v1527_v37 = vpack.c.bf16 (!%p1381_p12), %v1147_v27, %v1146_v8  ;;  %v1530_v46 = vpack.c.bf16 (!%p1381_p12), %v1149_v30, %v1148_v14  ;;  %v1382_v48 = vld [vmem:[%s2627_s8] ss:$0 sm:$0xff] (!%p1381_p12) }
 0x205   : > { %1495 = vmatpush3.bf16.msra.mxu0 %v1494_v2 }
 0x206   : > { %1497 = vmatprep.subr.bf16.mxu0 %v1496_v4 }
 0x209   : > { %1499 = vmatpush3.bf16.msra.mxu0 %v1498_v32 }
 0x20a   : > { %1501 = vmatprep.subr.bf16.mxu0 %v1500_v0 }
 0x20d   : > { %1503 = vmatpush3.bf16.msra.mxu0 %v1502_v10 }
 0x20e   : > { %1505 = vmatprep.subr.bf16.mxu0 %v1504_v16 }
 0x211   : > { %1507 = vmatpush3.bf16.msra.mxu0 %v1506_v18 }
 0x212   : > { %1508 = vmatprep.subr.bf16.mxu0 (!%p1381_p12), %v1853_v1 }
 0x214   : > { %1121 = vmatmul.mubr.f32.vlgmr.msra.gmra.mrb[0].mxu0 %v1022_v20 }
 0x215   : > { %1473 = vmatprep.mubr.msk.f32.mxu0 (!%p1381_p12), %vm1854_vm13, %v1855_v57  ;;  %1510 = vmatpush3.bf16.msra.mxu0 (!%p1381_p12), %v1509_v59 }
 0x216   : > { %1511 = vmatprep.subr.bf16.mxu0 (!%p1381_p12), %v1853_v1 }
 0x219   : > { %1513 = vmatpush3.bf16.msra.mxu0 (!%p1381_p12), %v1512_v35 }
 0x21a   : > { %1514 = vmatprep.subr.bf16.mxu0 (!%p1381_p12), %v1853_v1 }
 0x21d   : > { %1516 = vmatpush3.bf16.msra.mxu0 (!%p1381_p12), %v1515_v62 }
 0x21e   : > { %1517 = vmatprep.subr.bf16.mxu0 (!%p1381_p12), %v1853_v1 }
 0x221   : > { %1519 = vmatpush3.bf16.msra.mxu0 (!%p1381_p12), %v1518_v45 }
 0x222   : > { %1520 = vmatprep.subr.bf16.mxu0 (!%p1381_p12), %v1853_v1 }
 0x225   : > { %1522 = vmatpush3.bf16.msra.mxu0 (!%p1381_p12), %v1521_v36 }
 0x226   : > { %1523 = vmatprep.subr.bf16.mxu0 (!%p1381_p12), %v1853_v1 }
 0x229   : > { %1525 = vmatpush3.bf16.msra.mxu0 (!%p1381_p12), %v1524_v38 }
 0x22a   : > { %1526 = vmatprep.subr.bf16.mxu0 (!%p1381_p12), %v1853_v1 }
 0x22d   : > { %1528 = vmatpush3.bf16.msra.mxu0 (!%p1381_p12), %v1527_v37 }
 0x22e   : > { %1529 = vmatprep.subr.bf16.mxu0 (!%p1381_p12), %v1853_v1 }
 0x231   : > { %1531 = vmatpush3.bf16.msra.mxu0 (!%p1381_p12), %v1530_v46 }
 0x2e7   : > { %v1421_v44 = vpop.f32.mrb[0].mxu0  ;;  %1131 = sbr.rel (%p1381_p12) target bundleno = 976 (0x3d0), region = 84 }
 0x2e8   : > { %v1422_v42 = vpop.f32.mrb[1].mxu0 }
 0x2e9   : > { %v1423_v33 = vadd.f32 %v1422_v42, %v1421_v44 }
 0x2eb   : > { %v1126_v61 = vadd.f32 %v1423_v33, %v1018_v58 }
 0x2ed   : > { %1127 = vst [vmem:[#allocation3] sm:$0xff] %v1126_v61 }
 0x2f4   : > { %v1132_v47 = vld [vmem:[#allocation3] sm:$0xff] }
 0x2f5   : > { %v1133_v29 = vmax.f32 %v1132_v47, 0.0 }
 0x2f7   : > { %1474 = vmatmul.mubr.f32.vlgmr.msra.gmra.mrb[0].mxu0 %v1133_v29 }
 0x3ca   : > { %v1223_v53 = vpop.f32.mrb[0].mxu0 }
 0x3cb   : > { %v1224_v55 = vadd.f32 %v1382_v48, %v1223_v53  ;;  %v1475_v5 = vpop.f32.mrb[1].mxu0 }
 0x3cd   : > { %v1227_v43 = vmax.f32 %v1224_v55, 0.0 }
 0x3cf   : > { %1228 = vst [vmem:[#allocation14] sm:$0xff] %v1227_v43 }
 0x3d0 PF: > { %p1580_p0 = scmp.eq.s32.totalorder %s1926_s13, 2  ;;  %s1856_s29 = smov [#allocation14]  }
 0x3d1   : > { %s1236_s17 = sshll.u32 %s1856_s29, 4  ;;  %s1237_s17 = int_to_ptr.vmem [resolvable:$true] %s1236_s17 }
 0x3d2   : > { %s1751_s20 = scalar_lea.vmem %s1237_s17, 128  ;;  %p1758_p3 = scmp.lt.s32.totalorder %s1237_s17, %s1237_s17 }
 0x3d3   : > { %p1752_p2 = scmp.ne.s32.totalorder %s1237_s17, %s1751_s20  ;;  %p1759_p7 = scmp.lt.s32.totalorder %s1751_s20, %s1751_s20 }
 0x3d5   : > { %p1753_p11 = pnand %p1752_p2, %p1580_p0  ;;  %p1760_p10 = por %p1759_p7, %p1758_p3 }
 0x3d7   : > { %p1754_p13 = pneg %p1753_p11 }
 0x3d9   : > { %p1761_p1 = pnand %p1760_p10, %p1754_p13 }
 0x3db   : > { %1764 = shalt.err (!%p1761_p1)
}
 0x3dc   : > { %s1765_s15 = scalar_lea.hbm %s2628_s9, 128 }
 0x3dd   : > { %p1766_p8 = scmp.ne.s32.totalorder %s2628_s9, %s1765_s15  ;;  %p1771_p6 = scmp.lt.u32.totalorder %s1765_s15, %s2628_s9 }
 0x3df   : > { %p1767_p4 = pnand %p1766_p8, %p1580_p0 }
 0x3e1   : > { %p1768_p5 = pneg %p1767_p4 }
 0x3e3   : > { %p1773_p9 = pnand %p1771_p6, %p1768_p5 }
 0x3e5   : > { %1776 = shalt.err (!%p1773_p9)
}
 0x3e6   : > { %1551 = dma.vmem_to_hbm [thread:$0]  (%p1580_p0), %s1237_s17, 128, %s2628_s9, [#allocation6]  }
 0x3e7   : > { %1814 = dma.done.wait (%p1580_p0), [#allocation6], 128  }
 0x3e8   : > { %1816 = vsyncadd (%p1580_p0), [#allocation6], 4294967168 }
 0x3e9 PF: > { %p23_p12 = scmp.ge.s32.totalorder %s2027_s27, 5   ;;  %s2650_s30 = smov %s1823_s10 }
 0x3ea   : > { %s2651_s10 = smov %s1827_s11  ;;  %s2652_s11 = smov %s2038_s26 }
 0x3eb   : > { %s2653_s12 = smov %s2027_s27  ;;  %25 = sbr.rel (!%p23_p12) target bundleno = 9 (0x9), region = 123 }
 0x3f2   :  { %1249 = vsyncpa [#allocation5], 1 }
 0x3f3   :  { %1251 = vsyncpa [#allocation5 + $0x1], 1 }
 0x3f4   :  { %1252 = vsyncpa [#allocation12], 1 }
 0x3f5   :  { %1254 = vsyncpa [#allocation12 + $0x1], 1 }
 0x3f6   :  { %1255 = vsyncpa [#allocation6], 1 }
 0x3f7   :  { %1257 = vsyncpa [#allocation6 + $0x1], 1 }
 0x3f8   :  { %1258 = vsyncpa [#allocation7], 1 }
 0x3f9   :  { %1260 = vsyncpa [#allocation7 + $0x1], 1 }
 0x3fa   :  { %1261 = vsyncpa [#allocation8], 1 }
 0x3fb   :  { %1263 = vsyncpa [#allocation8 + $0x1], 1 }

</bundles_post_ra>
